<compile_context>
chip_gen: v6e
topology: v6e:2x2x1
jax: 0.10.0
libtpu: 0.0.40
codegen_flags: <defaults>
</compile_context>

<pallas_src>
import functools
import math

import jax
import jax.numpy as jnp
from jax.experimental import pallas as pl
from jax.experimental.pallas import tpu as pltpu


# ----------------------------------------------------------------------------
# In-kernel helpers (elementwise math in fp32; bf16 only at MXU inputs)
# ----------------------------------------------------------------------------

def _layernorm(v, g, b, eps=1e-5):
    # Two-pass variance (matches PyTorch LayerNorm numerics more closely than
    # the E[x^2]-mu^2 form).
    mu = jnp.mean(v, axis=-1, keepdims=True)
    c = v - mu
    var = jnp.mean(c * c, axis=-1, keepdims=True)
    return c * jax.lax.rsqrt(var + eps) * g + b


def _gelu_tanh(v):
    # TODO(synk): ViTBlock source not given; assume GELU activation (tanh
    # approx; exact-erf GELU differs by <~1e-3).
    c = math.sqrt(2.0 / math.pi)
    return 0.5 * v * (1.0 + jnp.tanh(c * (v + 0.044715 * v * v * v)))


def _pick_row_tile(n):
    for cand in (1024, 512, 256, 128):
        if n >= cand and n % cand == 0:
            return cand
    return n


def _vmem_limit_bytes():
    # Per-generation budget: leave headroom for Mosaic internal scratch and
    # the per-layer weight double-buffers.  64 MiB part (v7x) -> ~48 MiB,
    # 128 MiB parts (v5e/v6e) -> ~102 MiB.
    cap = 128 * 1024 * 1024
    try:
        info = pltpu.get_tpu_info()
        cap = int(getattr(info, "vmem_capacity_bytes", cap))
    except Exception:
        pass
    return int(min(cap * 0.8, cap - 16 * 1024 * 1024))


# ----------------------------------------------------------------------------
# Kernels
# ----------------------------------------------------------------------------

def patch_embed_kernel(p_ref, w_ref, b_ref, pos_ref, o_ref):
    # p_ref: (TM, C*p*p) bf16, w_ref: (C*p*p, D) bf16,
    # b_ref: (1, D) f32, pos_ref: (TM, D) f32  ->  o_ref: (TM, D) bf16
    out = jnp.dot(p_ref[...], w_ref[...], preferred_element_type=jnp.float32)
    o_ref[...] = (out + b_ref[...] + pos_ref[...]).astype(o_ref.dtype)


def fused_vit_kernel(x_ref, g1_ref, b1_ref, wqkv_ref, bqkv_ref,
                     wp_ref, bp_ref, g2_ref, b2_ref,
                     w1_ref, bb1_ref, w2_ref, bb2_ref,
                     gf_ref, bf_ref, o_ref, *, num_heads, kv_tile):
    """Grid = (batch sample, layer).  One grid step == one transformer layer
    on one sample; the fp32 activation lives directly in the resident output
    block (no scratch copy)."""
    layer = pl.program_id(1)

    @pl.when(layer == 0)
    def _():
        o_ref[...] = x_ref[...].astype(jnp.float32)

    x = o_ref[...]                                   # (N, D) fp32
    N, D = x.shape
    H = num_heads
    hd = D // H

    # ------------------ attention branch (pre-norm) ------------------
    h_ln = _layernorm(x, g1_ref[0], b1_ref[0]).astype(jnp.bfloat16)

    # Single lane-dense fused QKV matmul (output width 3D); softmax scale is
    # pre-folded into the Q columns of wqkv / bqkv by the wrapper.
    qkv = jnp.dot(h_ln, wqkv_ref[0],
                  preferred_element_type=jnp.float32) + bqkv_ref[0]  # (N, 3D)

    # Per-head scores from static lane slices + online softmax over KV tiles
    # (no (H, N, N) fp32 score tensor is ever materialized).
    # TODO(synk): for very long sequences also tile the query dimension.
    n_kv = N // kv_tile
    heads_out = []
    for h in range(H):
        q_h = qkv[:, h * hd:(h + 1) * hd].astype(jnp.bfloat16)
        k_h = qkv[:, D + h * hd:D + (h + 1) * hd].astype(jnp.bfloat16)
        v_h = qkv[:, 2 * D + h * hd:2 * D + (h + 1) * hd].astype(jnp.bfloat16)

        m_i = jnp.full((N, 1), -jnp.inf, jnp.float32)
        l_i = jnp.zeros((N, 1), jnp.float32)
        acc = jnp.zeros((N, hd), jnp.float32)
        for t in range(n_kv):
            k_t = k_h[t * kv_tile:(t + 1) * kv_tile, :]
            v_t = v_h[t * kv_tile:(t + 1) * kv_tile, :]
            s = jax.lax.dot_general(
                q_h, k_t, (((1,), (1,)), ((), ())),
                preferred_element_type=jnp.float32)          # (N, kv_tile)
            m_new = jnp.maximum(m_i, jnp.max(s, axis=-1, keepdims=True))
            alpha = jnp.exp(m_i - m_new)
            p = jnp.exp(s - m_new)
            l_i = alpha * l_i + jnp.sum(p, axis=-1, keepdims=True)
            acc = alpha * acc + jnp.dot(p.astype(jnp.bfloat16), v_t,
                                        preferred_element_type=jnp.float32)
            m_i = m_new
        heads_out.append(acc * pl.reciprocal(l_i, approx=True))

    attn = jnp.concatenate(heads_out, axis=-1)               # (N, D) fp32

    # Single full-depth output projection (contraction over D, not hd).
    proj = jnp.dot(attn.astype(jnp.bfloat16), wp_ref[0],
                   preferred_element_type=jnp.float32) + bp_ref[0]
    x = x + proj

    # ------------------ MLP branch ------------------
    h_ln = _layernorm(x, g2_ref[0], b2_ref[0]).astype(jnp.bfloat16)
    h1 = jnp.dot(h_ln, w1_ref[0],
                 preferred_element_type=jnp.float32) + bb1_ref[0]
    h1 = _gelu_tanh(h1)
    h2 = jnp.dot(h1.astype(jnp.bfloat16), w2_ref[0],
                 preferred_element_type=jnp.float32) + bb2_ref[0]
    x = x + h2

    o_ref[...] = x

    @pl.when(layer == pl.num_programs(1) - 1)
    def _():
        o_ref[...] = _layernorm(x, gf_ref[...], bf_ref[...])


# ----------------------------------------------------------------------------
# pallas_call wrappers
# ----------------------------------------------------------------------------

def patch_embed_call(patches, w, b, pos, batch):
    BN, CP2 = patches.shape
    D = w.shape[1]
    B = batch
    N = BN // B
    TM = _pick_row_tile(N)      # row tile per sample (512/1024 at real scale)
    nrt = N // TM

    return pl.pallas_call(
        patch_embed_kernel,
        out_shape=jax.ShapeDtypeStruct((BN, D), jnp.bfloat16),
        grid=(B, nrt),
        in_specs=[
            pl.BlockSpec((TM, CP2), lambda bi, r: (bi * nrt + r, 0)),
            pl.BlockSpec((CP2, D), lambda bi, r: (0, 0)),
            pl.BlockSpec((1, D), lambda bi, r: (0, 0)),
            pl.BlockSpec((TM, D), lambda bi, r: (r, 0)),     # pos: (N, D) once
        ],
        out_specs=pl.BlockSpec((TM, D), lambda bi, r: (bi * nrt + r, 0)),
        compiler_params=pltpu.CompilerParams(
            dimension_semantics=("parallel", "parallel")),
    )(patches, w, b, pos)


def fused_vit_call(x, stacked, gf, bf, num_heads, batch):
    BN, D = x.shape
    B = batch
    N = BN // B
    L = stacked["g1"].shape[0]
    Dh = stacked["w1"].shape[-1]

    # KV tile for the online-softmax loop: MXU-friendly multiples of 128/256.
    if N % 256 == 0:
        kv_tile = 256
    elif N % 128 == 0:
        kv_tile = 128
    else:
        kv_tile = N

    def per_layer(dims):
        nd = len(dims)
        return pl.BlockSpec((1,) + dims, lambda bi, l, nd=nd: (l,) + (0,) * nd)

    def const2(shape):
        return pl.BlockSpec(shape, lambda bi, l: (0, 0))

    kernel = functools.partial(fused_vit_kernel, num_heads=num_heads,
                               kv_tile=kv_tile)
    return pl.pallas_call(
        kernel,
        out_shape=jax.ShapeDtypeStruct((BN, D), jnp.float32),
        grid=(B, L),
        in_specs=[
            pl.BlockSpec((N, D), lambda bi, l: (bi, 0)),      # input activ.
            per_layer((1, D)), per_layer((1, D)),             # ln1
            per_layer((D, 3 * D)), per_layer((1, 3 * D)),     # fused qkv
            per_layer((D, D)), per_layer((1, D)),             # out proj
            per_layer((1, D)), per_layer((1, D)),             # ln2
            per_layer((D, Dh)), per_layer((1, Dh)),           # fc1
            per_layer((Dh, D)), per_layer((1, D)),            # fc2
            const2((1, D)), const2((1, D)),                   # final LN
        ],
        # Output block resident across the layer axis -> acts as the fp32
        # activation accumulator (no VMEM scratch copy needed).
        out_specs=pl.BlockSpec((N, D), lambda bi, l: (bi, 0)),
        compiler_params=pltpu.CompilerParams(
            dimension_semantics=("parallel", "arbitrary"),
            vmem_limit_bytes=_vmem_limit_bytes()),
    )(x,
      stacked["g1"], stacked["b1"], stacked["wqkv"], stacked["bqkv"],
      stacked["wp"], stacked["bp"], stacked["g2"], stacked["b2"],
      stacked["w1"], stacked["bb1"], stacked["w2"], stacked["bb2"],
      gf, bf)


# ----------------------------------------------------------------------------
# Parameter setup / restructuring (plain JAX glue, runs once)
# ----------------------------------------------------------------------------

def get_posembed(embed_dim, grid_size, temperature=10000.0):
    scale = 2.0 * math.pi
    num_pos_feats = embed_dim // 2
    y_embed, x_embed = jnp.meshgrid(
        jnp.arange(grid_size, dtype=jnp.float32),
        jnp.arange(grid_size, dtype=jnp.float32), indexing="ij")
    y_embed = y_embed / (grid_size + 1e-6) * scale
    x_embed = x_embed / (grid_size + 1e-6) * scale
    dim_t = jnp.arange(num_pos_feats, dtype=jnp.float32)
    dim_t_ = jnp.floor(dim_t / 2.0) / num_pos_feats
    dim_t = temperature ** (2.0 * dim_t_)
    pos_x = x_embed[..., None] / dim_t
    pos_y = y_embed[..., None] / dim_t
    pos_x = jnp.stack((jnp.sin(pos_x[..., 0::2]), jnp.cos(pos_x[..., 1::2])),
                      axis=-1).reshape(grid_size, grid_size, num_pos_feats)
    pos_y = jnp.stack((jnp.sin(pos_y[..., 0::2]), jnp.cos(pos_y[..., 1::2])),
                      axis=-1).reshape(grid_size, grid_size, num_pos_feats)
    pos = jnp.concatenate((pos_y, pos_x), axis=-1).reshape(-1, embed_dim)
    return pos  # (N, D)


def xavier_uniform(key, fan_in, fan_out):
    limit = math.sqrt(6.0 / (fan_in + fan_out))
    return jax.random.uniform(key, (fan_in, fan_out), jnp.float32, -limit, limit)


def init_params(key, in_dim, patch_size, D, num_layers, mlp_ratio):
    CP2 = in_dim * patch_size * patch_size
    Dh = int(D * mlp_ratio)
    keys = iter(jax.random.split(key, 8 + 8 * num_layers))
    params = {
        "patch_w": xavier_uniform(next(keys), CP2, D),
        "patch_b": jnp.zeros((1, D), jnp.float32),
        "gfin": jnp.ones((1, D), jnp.float32),
        "bfin": jnp.zeros((1, D), jnp.float32),
        "blocks": [],
    }
    for _ in range(num_layers):
        params["blocks"].append({
            "g1": jnp.ones((1, D), jnp.float32),
            "b1": jnp.zeros((1, D), jnp.float32),
            "wqkv": xavier_uniform(next(keys), D, 3 * D),
            "bqkv": jnp.zeros((1, 3 * D), jnp.float32),   # qkv_bias=True
            "wproj": xavier_uniform(next(keys), D, D),
            "bproj": jnp.zeros((1, D), jnp.float32),
            "g2": jnp.ones((1, D), jnp.float32),
            "b2": jnp.zeros((1, D), jnp.float32),
            "w1": xavier_uniform(next(keys), D, Dh),
            "bb1": jnp.zeros((1, Dh), jnp.float32),
            "w2": xavier_uniform(next(keys), Dh, D),
            "bb2": jnp.zeros((1, D), jnp.float32),
        })
    return params


def pack_blocks(blocks, num_heads):
    """Stack per-layer params along a leading layer axis, fold the softmax
    scale into the Q columns of the packed (D, 3D) QKV weight/bias, and cast
    all MXU weights to bf16 (biases stay lane-dense fp32)."""
    D = blocks[0]["wqkv"].shape[0]
    hd = D // num_heads
    scale = 1.0 / math.sqrt(hd)
    bf16 = jnp.bfloat16
    qscale = jnp.concatenate([jnp.full((D,), scale, jnp.float32),
                              jnp.ones((2 * D,), jnp.float32)])

    def stack(fn):
        return jnp.stack([fn(b) for b in blocks])

    return {
        "g1": stack(lambda b: b["g1"]),
        "b1": stack(lambda b: b["b1"]),
        "wqkv": stack(lambda b: (b["wqkv"] * qscale[None, :]).astype(bf16)),
        "bqkv": stack(lambda b: b["bqkv"] * qscale[None, :]),
        "wp": stack(lambda b: b["wproj"].astype(bf16)),
        "bp": stack(lambda b: b["bproj"]),
        "g2": stack(lambda b: b["g2"]),
        "b2": stack(lambda b: b["b2"]),
        "w1": stack(lambda b: b["w1"].astype(bf16)),
        "bb1": stack(lambda b: b["bb1"]),
        "w2": stack(lambda b: b["w2"].astype(bf16)),
        "bb2": stack(lambda b: b["bb2"]),
    }


# ----------------------------------------------------------------------------
# Forward
# ----------------------------------------------------------------------------

def image_encoder_vit_forward(x_nchw, params, patch_size, num_heads):
    # x_nchw: (B, C, H, W)  ->  output: (B, N, D)
    B, C, Hh, Ww = x_nchw.shape
    gh, gw = Hh // patch_size, Ww // patch_size
    N = gh * gw
    CP2 = C * patch_size * patch_size
    D = params["patch_w"].shape[1]

    # im2col (non-overlapping conv == per-patch matmul); (c,u,v) flattening.
    xp = x_nchw.reshape(B, C, gh, patch_size, gw, patch_size)
    xp = xp.transpose(0, 2, 4, 1, 3, 5).reshape(B * N, CP2)

    pos = get_posembed(D, gh)                                # (N, D), no tile

    h = patch_embed_call(xp.astype(jnp.bfloat16),
                         params["patch_w"].astype(jnp.bfloat16),
                         params["patch_b"], pos, B)

    stacked = pack_blocks(params["blocks"], num_heads)
    out = fused_vit_call(h, stacked, params["gfin"], params["bfin"],
                         num_heads, B)
    return out.reshape(B, N, D)


# ----------------------------------------------------------------------------
# Main
# ----------------------------------------------------------------------------

if __name__ == "__main__":
    # Small config consistent with the module's constructor.
    img_size, patch_size, in_dim = 16, 4, 4
    patch_embed_dim, num_layers, num_heads, mlp_ratio = 32, 2, 4, 4.0
    B = 2

    key = jax.random.PRNGKey(0)
    k_x, k_p = jax.random.split(key)

    x = jax.random.normal(k_x, (B, in_dim, img_size, img_size), jnp.float32)
    params = init_params(k_p, in_dim, patch_size, patch_embed_dim,
                         num_layers, mlp_ratio)

    fwd = jax.jit(functools.partial(image_encoder_vit_forward,
                                    patch_size=patch_size,
                                    num_heads=num_heads))
    out = jax.block_until_ready(fwd(x, params))

    assert out.shape == (B, (img_size // patch_size) ** 2, patch_embed_dim)
    assert bool(jnp.all(jnp.isfinite(out)))
    print("KERNEL_OK")
</pallas_src>

<mosaic_0001>
module attributes {stable_mosaic.version = 11 : i64} {
  func.func @patch_embed_kernel(%arg0: i32, %arg1: i32, %arg2: memref<16x64xbf16, #tpu.memory_space<vmem>>, %arg3: memref<64x32xbf16, #tpu.memory_space<vmem>>, %arg4: memref<1x32xf32, #tpu.memory_space<vmem>>, %arg5: memref<16x32xf32, #tpu.memory_space<vmem>>, %arg6: memref<16x32xbf16, #tpu.memory_space<vmem>>) attributes {dimension_semantics = [#tpu.dimension_semantics<parallel>, #tpu.dimension_semantics<parallel>], iteration_bounds = array<i64: 2, 1>, scalar_prefetch = 0 : i64, scratch_operands = 0 : i64, tpu.core_type = #tpu.core_type<tc>, window_params = [{transform_indices = @transform_0, window_bounds = array<i64: 16, 64>}, {pipeline_mode = #tpu.pipeline_mode<synchronous>, transform_indices = @transform_1, window_bounds = array<i64: 64, 32>}, {pipeline_mode = #tpu.pipeline_mode<synchronous>, transform_indices = @transform_2, window_bounds = array<i64: 1, 32>}, {transform_indices = @transform_3, window_bounds = array<i64: 16, 32>}, {transform_indices = @transform_4, window_bounds = array<i64: 16, 32>}]} {
    %c0 = arith.constant 0 : index
    %c0_0 = arith.constant 0 : index
    %0 = vector.load %arg2[%c0, %c0_0] : memref<16x64xbf16, #tpu.memory_space<vmem>>, vector<16x64xbf16>
    %c0_1 = arith.constant 0 : index
    %c0_2 = arith.constant 0 : index
    %1 = vector.load %arg3[%c0_1, %c0_2] : memref<64x32xbf16, #tpu.memory_space<vmem>>, vector<64x32xbf16>
    %cst = arith.constant dense<0.000000e+00> : vector<16x32xf32>
    %2 = tpu.matmul %0, %1, %cst {dimension_numbers = #tpu.dot_dimension_numbers<[1], [0], [0], [1], [0, 0, 1, 1], [], []>} : vector<16x64xbf16>, vector<64x32xbf16>, vector<16x32xf32> -> vector<16x32xf32>
    %c0_3 = arith.constant 0 : index
    %c0_4 = arith.constant 0 : index
    %3 = vector.load %arg4[%c0_3, %c0_4] : memref<1x32xf32, #tpu.memory_space<vmem>>, vector<1x32xf32>
    %4 = vector.broadcast %3 : vector<1x32xf32> to vector<16x32xf32>
    %5 = arith.addf %2, %4 : vector<16x32xf32>
    %c0_5 = arith.constant 0 : index
    %c0_6 = arith.constant 0 : index
    %6 = vector.load %arg5[%c0_5, %c0_6] : memref<16x32xf32, #tpu.memory_space<vmem>>, vector<16x32xf32>
    %7 = arith.addf %5, %6 : vector<16x32xf32>
    %8 = arith.truncf %7 : vector<16x32xf32> to vector<16x32xbf16>
    %c0_7 = arith.constant 0 : index
    %c0_8 = arith.constant 0 : index
    %9 = vector.load %arg6[%c0_7, %c0_8] : memref<16x32xbf16, #tpu.memory_space<vmem>>, vector<16x32xbf16>
    tpu.vector_store %arg6[%c0_7, %c0_8], %8 {strides = array<i32>} : memref<16x32xbf16, #tpu.memory_space<vmem>>, vector<16x32xbf16>,
    return
  }
  func.func @transform_0(%arg0: i32, %arg1: i32) -> (i32, i32) {
    %c1_i32 = arith.constant 1 : i32
    %0 = arith.muli %arg0, %c1_i32 : i32
    %1 = arith.addi %0, %arg1 : i32
    %c0_i32 = arith.constant 0 : i32
    %c0_i32_0 = arith.constant 0 : i32
    return %1, %c0_i32 : i32, i32
  }
  func.func @transform_1(%arg0: i32, %arg1: i32) -> (i32, i32) {
    %c0_i32 = arith.constant 0 : i32
    %c0_i32_0 = arith.constant 0 : i32
    %c0_i32_1 = arith.constant 0 : i32
    return %c0_i32, %c0_i32_0 : i32, i32
  }
  func.func @transform_2(%arg0: i32, %arg1: i32) -> (i32, i32) {
    %c0_i32 = arith.constant 0 : i32
    %c0_i32_0 = arith.constant 0 : i32
    %c0_i32_1 = arith.constant 0 : i32
    return %c0_i32, %c0_i32_0 : i32, i32
  }
  func.func @transform_3(%arg0: i32, %arg1: i32) -> (i32, i32) {
    %c0_i32 = arith.constant 0 : i32
    %c0_i32_0 = arith.constant 0 : i32
    return %arg1, %c0_i32 : i32, i32
  }
  func.func @transform_4(%arg0: i32, %arg1: i32) -> (i32, i32) {
    %c1_i32 = arith.constant 1 : i32
    %0 = arith.muli %arg0, %c1_i32 : i32
    %1 = arith.addi %0, %arg1 : i32
    %c0_i32 = arith.constant 0 : i32
    %c0_i32_0 = arith.constant 0 : i32
    return %1, %c0_i32 : i32, i32
  }
}

module attributes {stable_mosaic.version = 11 : i64} {
  func.func @fused_vit_kernel(%arg0: i32, %arg1: i32, %arg2: memref<16x32xbf16, #tpu.memory_space<vmem>>, %arg3: memref<1x1x32xf32, #tpu.memory_space<vmem>>, %arg4: memref<1x1x32xf32, #tpu.memory_space<vmem>>, %arg5: memref<1x32x96xbf16, #tpu.memory_space<vmem>>, %arg6: memref<1x1x96xf32, #tpu.memory_space<vmem>>, %arg7: memref<1x32x32xbf16, #tpu.memory_space<vmem>>, %arg8: memref<1x1x32xf32, #tpu.memory_space<vmem>>, %arg9: memref<1x1x32xf32, #tpu.memory_space<vmem>>, %arg10: memref<1x1x32xf32, #tpu.memory_space<vmem>>, %arg11: memref<1x32x128xbf16, #tpu.memory_space<vmem>>, %arg12: memref<1x1x128xf32, #tpu.memory_space<vmem>>, %arg13: memref<1x128x32xbf16, #tpu.memory_space<vmem>>, %arg14: memref<1x1x32xf32, #tpu.memory_space<vmem>>, %arg15: memref<1x32xf32, #tpu.memory_space<vmem>>, %arg16: memref<1x32xf32, #tpu.memory_space<vmem>>, %arg17: memref<16x32xf32, #tpu.memory_space<vmem>>) attributes {dimension_semantics = [#tpu.dimension_semantics<parallel>, #tpu.dimension_semantics<arbitrary>], iteration_bounds = array<i64: 2, 2>, scalar_prefetch = 0 : i64, scratch_operands = 0 : i64, tpu.core_type = #tpu.core_type<tc>, window_params = [{transform_indices = @transform_0, window_bounds = array<i64: 16, 32>}, {transform_indices = @transform_1, window_bounds = array<i64: 1, 1, 32>}, {transform_indices = @transform_2, window_bounds = array<i64: 1, 1, 32>}, {transform_indices = @transform_3, window_bounds = array<i64: 1, 32, 96>}, {transform_indices = @transform_4, window_bounds = array<i64: 1, 1, 96>}, {transform_indices = @transform_5, window_bounds = array<i64: 1, 32, 32>}, {transform_indices = @transform_6, window_bounds = array<i64: 1, 1, 32>}, {transform_indices = @transform_7, window_bounds = array<i64: 1, 1, 32>}, {transform_indices = @transform_8, window_bounds = array<i64: 1, 1, 32>}, {transform_indices = @transform_9, window_bounds = array<i64: 1, 32, 128>}, {transform_indices = @transform_10, window_bounds = array<i64: 1, 1, 128>}, {transform_indices = @transform_11, window_bounds = array<i64: 1, 128, 32>}, {transform_indices = @transform_12, window_bounds = array<i64: 1, 1, 32>}, {pipeline_mode = #tpu.pipeline_mode<synchronous>, transform_indices = @transform_13, window_bounds = array<i64: 1, 32>}, {pipeline_mode = #tpu.pipeline_mode<synchronous>, transform_indices = @transform_14, window_bounds = array<i64: 1, 32>}, {transform_indices = @transform_15, window_bounds = array<i64: 16, 32>}]} {
    %c0_i32 = arith.constant 0 : i32
    %0 = arith.cmpi eq, %arg1, %c0_i32 : i32
    %1 = arith.extui %0 : i1 to i32
    %c0_i32_0 = arith.constant 0 : i32
    %2 = arith.cmpi ne, %1, %c0_i32_0 : i32
    scf.if %2 {
      %c0_86 = arith.constant 0 : index
      %c0_87 = arith.constant 0 : index
      %224 = vector.load %arg2[%c0_86, %c0_87] : memref<16x32xbf16, #tpu.memory_space<vmem>>, vector<16x32xbf16>
      %225 = arith.extf %224 : vector<16x32xbf16> to vector<16x32xf32>
      %c0_88 = arith.constant 0 : index
      %c0_89 = arith.constant 0 : index
      %226 = vector.load %arg17[%c0_88, %c0_89] : memref<16x32xf32, #tpu.memory_space<vmem>>, vector<16x32xf32>
      tpu.vector_store %arg17[%c0_88, %c0_89], %225 {strides = array<i32>} : memref<16x32xf32, #tpu.memory_space<vmem>>, vector<16x32xf32>,
    } else {
    }
    %c0 = arith.constant 0 : index
    %c0_1 = arith.constant 0 : index
    %3 = vector.load %arg17[%c0, %c0_1] : memref<16x32xf32, #tpu.memory_space<vmem>>, vector<16x32xf32>
    %c0_2 = arith.constant 0 : index
    %c0_3 = arith.constant 0 : index
    %c0_4 = arith.constant 0 : index
    %4 = vector.load %arg3[%c0_2, %c0_3, %c0_4] : memref<1x1x32xf32, #tpu.memory_space<vmem>>, vector<1x1x32xf32>
    %5 = vector.shape_cast %4 : vector<1x1x32xf32> to vector<1x32xf32>
    %c0_5 = arith.constant 0 : index
    %c0_6 = arith.constant 0 : index
    %c0_7 = arith.constant 0 : index
    %6 = vector.load %arg4[%c0_5, %c0_6, %c0_7] : memref<1x1x32xf32, #tpu.memory_space<vmem>>, vector<1x1x32xf32>
    %7 = vector.shape_cast %6 : vector<1x1x32xf32> to vector<1x32xf32>
    %cst = arith.constant dense<0.000000e+00> : vector<16xf32>
    %8 = vector.multi_reduction <add>, %3, %cst [1] : vector<16x32xf32> to vector<16xf32>
    %9 = vector.shape_cast %8 : vector<16xf32> to vector<16x1xf32>
    %cst_8 = arith.constant 3.200000e+01 : f32
    %10 = vector.broadcast %cst_8 : f32 to vector<16x1xf32>
    %11 = arith.divf %9, %10 : vector<16x1xf32>
    %12 = vector.broadcast %11 : vector<16x1xf32> to vector<16x32xf32>
    %13 = arith.subf %3, %12 : vector<16x32xf32>
    %14 = arith.mulf %13, %13 : vector<16x32xf32>
    %cst_9 = arith.constant dense<0.000000e+00> : vector<16xf32>
    %15 = vector.multi_reduction <add>, %14, %cst_9 [1] : vector<16x32xf32> to vector<16xf32>
    %16 = vector.shape_cast %15 : vector<16xf32> to vector<16x1xf32>
    %cst_10 = arith.constant 3.200000e+01 : f32
    %17 = vector.broadcast %cst_10 : f32 to vector<16x1xf32>
    %18 = arith.divf %16, %17 : vector<16x1xf32>
    %cst_11 = arith.constant 9.99999974E-6 : f32
    %19 = vector.broadcast %cst_11 : f32 to vector<16x1xf32>
    %20 = arith.addf %18, %19 : vector<16x1xf32>
    %21 = math.rsqrt %20 : vector<16x1xf32>
    %22 = vector.broadcast %21 : vector<16x1xf32> to vector<16x32xf32>
    %23 = arith.mulf %13, %22 : vector<16x32xf32>
    %24 = vector.broadcast %5 : vector<1x32xf32> to vector<16x32xf32>
    %25 = arith.mulf %23, %24 : vector<16x32xf32>
    %26 = vector.broadcast %7 : vector<1x32xf32> to vector<16x32xf32>
    %27 = arith.addf %25, %26 : vector<16x32xf32>
    %28 = arith.truncf %27 : vector<16x32xf32> to vector<16x32xbf16>
    %c0_12 = arith.constant 0 : index
    %c0_13 = arith.constant 0 : index
    %c0_14 = arith.constant 0 : index
    %29 = vector.load %arg5[%c0_12, %c0_13, %c0_14] : memref<1x32x96xbf16, #tpu.memory_space<vmem>>, vector<1x32x96xbf16>
    %30 = vector.shape_cast %29 : vector<1x32x96xbf16> to vector<32x96xbf16>
    %cst_15 = arith.constant dense<0.000000e+00> : vector<16x96xf32>
    %31 = tpu.matmul %28, %30, %cst_15 {dimension_numbers = #tpu.dot_dimension_numbers<[1], [0], [0], [1], [0, 0, 1, 1], [], []>} : vector<16x32xbf16>, vector<32x96xbf16>, vector<16x96xf32> -> vector<16x96xf32>
    %c0_16 = arith.constant 0 : index
    %c0_17 = arith.constant 0 : index
    %c0_18 = arith.constant 0 : index
    %32 = vector.load %arg6[%c0_16, %c0_17, %c0_18] : memref<1x1x96xf32, #tpu.memory_space<vmem>>, vector<1x1x96xf32>
    %33 = vector.shape_cast %32 : vector<1x1x96xf32> to vector<1x96xf32>
    %34 = vector.broadcast %33 : vector<1x96xf32> to vector<16x96xf32>
    %35 = arith.addf %31, %34 : vector<16x96xf32>
    %36 = vector.extract_strided_slice %35 {offsets = [0, 0], sizes = [16, 8], strides = [1, 1]} : vector<16x96xf32> to vector<16x8xf32>
    %37 = arith.truncf %36 : vector<16x8xf32> to vector<16x8xbf16>
    %38 = vector.extract_strided_slice %35 {offsets = [0, 32], sizes = [16, 8], strides = [1, 1]} : vector<16x96xf32> to vector<16x8xf32>
    %39 = arith.truncf %38 : vector<16x8xf32> to vector<16x8xbf16>
    %40 = vector.extract_strided_slice %35 {offsets = [0, 64], sizes = [16, 8], strides = [1, 1]} : vector<16x96xf32> to vector<16x8xf32>
    %41 = arith.truncf %40 : vector<16x8xf32> to vector<16x8xbf16>
    %cst_19 = arith.constant 0xFF800000 : f32
    %42 = vector.broadcast %cst_19 : f32 to vector<16x1xf32>
    %cst_20 = arith.constant 0.000000e+00 : f32
    %43 = vector.broadcast %cst_20 : f32 to vector<16x1xf32>
    %cst_21 = arith.constant 0.000000e+00 : f32
    %44 = vector.broadcast %cst_21 : f32 to vector<16x8xf32>
    %cst_22 = arith.constant dense<0.000000e+00> : vector<16x16xf32>
    %45 = tpu.matmul %37, %39, %cst_22 {dimension_numbers = #tpu.dot_dimension_numbers<[1], [1], [0], [0], [0, 0, 1, 0], [], []>} : vector<16x8xbf16>, vector<16x8xbf16>, vector<16x16xf32> -> vector<16x16xf32>
    %cst_23 = arith.constant dense<0xFF800000> : vector<16xf32>
    %46 = vector.multi_reduction <maximumf>, %45, %cst_23 [1] : vector<16x16xf32> to vector<16xf32>
    %47 = vector.shape_cast %46 : vector<16xf32> to vector<16x1xf32>
    %48 = arith.maximumf %42, %47 : vector<16x1xf32>
    %49 = arith.subf %42, %48 : vector<16x1xf32>
    %50 = math.exp %49 : vector<16x1xf32>
    %51 = vector.broadcast %48 : vector<16x1xf32> to vector<16x16xf32>
    %52 = arith.subf %45, %51 : vector<16x16xf32>
    %53 = math.exp %52 : vector<16x16xf32>
    %54 = arith.mulf %50, %43 : vector<16x1xf32>
    %cst_24 = arith.constant dense<0.000000e+00> : vector<16xf32>
    %55 = vector.multi_reduction <add>, %53, %cst_24 [1] : vector<16x16xf32> to vector<16xf32>
    %56 = vector.shape_cast %55 : vector<16xf32> to vector<16x1xf32>
    %57 = arith.addf %54, %56 : vector<16x1xf32>
    %58 = vector.broadcast %50 : vector<16x1xf32> to vector<16x8xf32>
    %59 = arith.mulf %58, %44 : vector<16x8xf32>
    %60 = arith.truncf %53 : vector<16x16xf32> to vector<16x16xbf16>
    %cst_25 = arith.constant dense<0.000000e+00> : vector<16x8xf32>
    %61 = tpu.matmul %60, %41, %cst_25 {dimension_numbers = #tpu.dot_dimension_numbers<[1], [0], [0], [1], [0, 0, 1, 1], [], []>} : vector<16x16xbf16>, vector<16x8xbf16>, vector<16x8xf32> -> vector<16x8xf32>
    %62 = arith.addf %59, %61 : vector<16x8xf32>
    %63 = tpu.reciprocal %57 {approx = true} : vector<16x1xf32> -> vector<16x1xf32>
    %64 = vector.broadcast %63 : vector<16x1xf32> to vector<16x8xf32>
    %65 = arith.mulf %62, %64 : vector<16x8xf32>
    %66 = vector.extract_strided_slice %35 {offsets = [0, 8], sizes = [16, 8], strides = [1, 1]} : vector<16x96xf32> to vector<16x8xf32>
    %67 = arith.truncf %66 : vector<16x8xf32> to vector<16x8xbf16>
    %68 = vector.extract_strided_slice %35 {offsets = [0, 40], sizes = [16, 8], strides = [1, 1]} : vector<16x96xf32> to vector<16x8xf32>
    %69 = arith.truncf %68 : vector<16x8xf32> to vector<16x8xbf16>
    %70 = vector.extract_strided_slice %35 {offsets = [0, 72], sizes = [16, 8], strides = [1, 1]} : vector<16x96xf32> to vector<16x8xf32>
    %71 = arith.truncf %70 : vector<16x8xf32> to vector<16x8xbf16>
    %cst_26 = arith.constant 0xFF800000 : f32
    %72 = vector.broadcast %cst_26 : f32 to vector<16x1xf32>
    %cst_27 = arith.constant 0.000000e+00 : f32
    %73 = vector.broadcast %cst_27 : f32 to vector<16x1xf32>
    %cst_28 = arith.constant 0.000000e+00 : f32
    %74 = vector.broadcast %cst_28 : f32 to vector<16x8xf32>
    %cst_29 = arith.constant dense<0.000000e+00> : vector<16x16xf32>
    %75 = tpu.matmul %67, %69, %cst_29 {dimension_numbers = #tpu.dot_dimension_numbers<[1], [1], [0], [0], [0, 0, 1, 0], [], []>} : vector<16x8xbf16>, vector<16x8xbf16>, vector<16x16xf32> -> vector<16x16xf32>
    %cst_30 = arith.constant dense<0xFF800000> : vector<16xf32>
    %76 = vector.multi_reduction <maximumf>, %75, %cst_30 [1] : vector<16x16xf32> to vector<16xf32>
    %77 = vector.shape_cast %76 : vector<16xf32> to vector<16x1xf32>
    %78 = arith.maximumf %72, %77 : vector<16x1xf32>
    %79 = arith.subf %72, %78 : vector<16x1xf32>
    %80 = math.exp %79 : vector<16x1xf32>
    %81 = vector.broadcast %78 : vector<16x1xf32> to vector<16x16xf32>
    %82 = arith.subf %75, %81 : vector<16x16xf32>
    %83 = math.exp %82 : vector<16x16xf32>
    %84 = arith.mulf %80, %73 : vector<16x1xf32>
    %cst_31 = arith.constant dense<0.000000e+00> : vector<16xf32>
    %85 = vector.multi_reduction <add>, %83, %cst_31 [1] : vector<16x16xf32> to vector<16xf32>
    %86 = vector.shape_cast %85 : vector<16xf32> to vector<16x1xf32>
    %87 = arith.addf %84, %86 : vector<16x1xf32>
    %88 = vector.broadcast %80 : vector<16x1xf32> to vector<16x8xf32>
    %89 = arith.mulf %88, %74 : vector<16x8xf32>
    %90 = arith.truncf %83 : vector<16x16xf32> to vector<16x16xbf16>
    %cst_32 = arith.constant dense<0.000000e+00> : vector<16x8xf32>
    %91 = tpu.matmul %90, %71, %cst_32 {dimension_numbers = #tpu.dot_dimension_numbers<[1], [0], [0], [1], [0, 0, 1, 1], [], []>} : vector<16x16xbf16>, vector<16x8xbf16>, vector<16x8xf32> -> vector<16x8xf32>
    %92 = arith.addf %89, %91 : vector<16x8xf32>
    %93 = tpu.reciprocal %87 {approx = true} : vector<16x1xf32> -> vector<16x1xf32>
    %94 = vector.broadcast %93 : vector<16x1xf32> to vector<16x8xf32>
    %95 = arith.mulf %92, %94 : vector<16x8xf32>
    %96 = vector.extract_strided_slice %35 {offsets = [0, 16], sizes = [16, 8], strides = [1, 1]} : vector<16x96xf32> to vector<16x8xf32>
    %97 = arith.truncf %96 : vector<16x8xf32> to vector<16x8xbf16>
    %98 = vector.extract_strided_slice %35 {offsets = [0, 48], sizes = [16, 8], strides = [1, 1]} : vector<16x96xf32> to vector<16x8xf32>
    %99 = arith.truncf %98 : vector<16x8xf32> to vector<16x8xbf16>
    %100 = vector.extract_strided_slice %35 {offsets = [0, 80], sizes = [16, 8], strides = [1, 1]} : vector<16x96xf32> to vector<16x8xf32>
    %101 = arith.truncf %100 : vector<16x8xf32> to vector<16x8xbf16>
    %cst_33 = arith.constant 0xFF800000 : f32
    %102 = vector.broadcast %cst_33 : f32 to vector<16x1xf32>
    %cst_34 = arith.constant 0.000000e+00 : f32
    %103 = vector.broadcast %cst_34 : f32 to vector<16x1xf32>
    %cst_35 = arith.constant 0.000000e+00 : f32
    %104 = vector.broadcast %cst_35 : f32 to vector<16x8xf32>
    %cst_36 = arith.constant dense<0.000000e+00> : vector<16x16xf32>
    %105 = tpu.matmul %97, %99, %cst_36 {dimension_numbers = #tpu.dot_dimension_numbers<[1], [1], [0], [0], [0, 0, 1, 0], [], []>} : vector<16x8xbf16>, vector<16x8xbf16>, vector<16x16xf32> -> vector<16x16xf32>
    %cst_37 = arith.constant dense<0xFF800000> : vector<16xf32>
    %106 = vector.multi_reduction <maximumf>, %105, %cst_37 [1] : vector<16x16xf32> to vector<16xf32>
    %107 = vector.shape_cast %106 : vector<16xf32> to vector<16x1xf32>
    %108 = arith.maximumf %102, %107 : vector<16x1xf32>
    %109 = arith.subf %102, %108 : vector<16x1xf32>
    %110 = math.exp %109 : vector<16x1xf32>
    %111 = vector.broadcast %108 : vector<16x1xf32> to vector<16x16xf32>
    %112 = arith.subf %105, %111 : vector<16x16xf32>
    %113 = math.exp %112 : vector<16x16xf32>
    %114 = arith.mulf %110, %103 : vector<16x1xf32>
    %cst_38 = arith.constant dense<0.000000e+00> : vector<16xf32>
    %115 = vector.multi_reduction <add>, %113, %cst_38 [1] : vector<16x16xf32> to vector<16xf32>
    %116 = vector.shape_cast %115 : vector<16xf32> to vector<16x1xf32>
    %117 = arith.addf %114, %116 : vector<16x1xf32>
    %118 = vector.broadcast %110 : vector<16x1xf32> to vector<16x8xf32>
    %119 = arith.mulf %118, %104 : vector<16x8xf32>
    %120 = arith.truncf %113 : vector<16x16xf32> to vector<16x16xbf16>
    %cst_39 = arith.constant dense<0.000000e+00> : vector<16x8xf32>
    %121 = tpu.matmul %120, %101, %cst_39 {dimension_numbers = #tpu.dot_dimension_numbers<[1], [0], [0], [1], [0, 0, 1, 1], [], []>} : vector<16x16xbf16>, vector<16x8xbf16>, vector<16x8xf32> -> vector<16x8xf32>
    %122 = arith.addf %119, %121 : vector<16x8xf32>
    %123 = tpu.reciprocal %117 {approx = true} : vector<16x1xf32> -> vector<16x1xf32>
    %124 = vector.broadcast %123 : vector<16x1xf32> to vector<16x8xf32>
    %125 = arith.mulf %122, %124 : vector<16x8xf32>
    %126 = vector.extract_strided_slice %35 {offsets = [0, 24], sizes = [16, 8], strides = [1, 1]} : vector<16x96xf32> to vector<16x8xf32>
    %127 = arith.truncf %126 : vector<16x8xf32> to vector<16x8xbf16>
    %128 = vector.extract_strided_slice %35 {offsets = [0, 56], sizes = [16, 8], strides = [1, 1]} : vector<16x96xf32> to vector<16x8xf32>
    %129 = arith.truncf %128 : vector<16x8xf32> to vector<16x8xbf16>
    %130 = vector.extract_strided_slice %35 {offsets = [0, 88], sizes = [16, 8], strides = [1, 1]} : vector<16x96xf32> to vector<16x8xf32>
    %131 = arith.truncf %130 : vector<16x8xf32> to vector<16x8xbf16>
    %cst_40 = arith.constant 0xFF800000 : f32
    %132 = vector.broadcast %cst_40 : f32 to vector<16x1xf32>
    %cst_41 = arith.constant 0.000000e+00 : f32
    %133 = vector.broadcast %cst_41 : f32 to vector<16x1xf32>
    %cst_42 = arith.constant 0.000000e+00 : f32
    %134 = vector.broadcast %cst_42 : f32 to vector<16x8xf32>
    %cst_43 = arith.constant dense<0.000000e+00> : vector<16x16xf32>
    %135 = tpu.matmul %127, %129, %cst_43 {dimension_numbers = #tpu.dot_dimension_numbers<[1], [1], [0], [0], [0, 0, 1, 0], [], []>} : vector<16x8xbf16>, vector<16x8xbf16>, vector<16x16xf32> -> vector<16x16xf32>
    %cst_44 = arith.constant dense<0xFF800000> : vector<16xf32>
    %136 = vector.multi_reduction <maximumf>, %135, %cst_44 [1] : vector<16x16xf32> to vector<16xf32>
    %137 = vector.shape_cast %136 : vector<16xf32> to vector<16x1xf32>
    %138 = arith.maximumf %132, %137 : vector<16x1xf32>
    %139 = arith.subf %132, %138 : vector<16x1xf32>
    %140 = math.exp %139 : vector<16x1xf32>
    %141 = vector.broadcast %138 : vector<16x1xf32> to vector<16x16xf32>
    %142 = arith.subf %135, %141 : vector<16x16xf32>
    %143 = math.exp %142 : vector<16x16xf32>
    %144 = arith.mulf %140, %133 : vector<16x1xf32>
    %cst_45 = arith.constant dense<0.000000e+00> : vector<16xf32>
    %145 = vector.multi_reduction <add>, %143, %cst_45 [1] : vector<16x16xf32> to vector<16xf32>
    %146 = vector.shape_cast %145 : vector<16xf32> to vector<16x1xf32>
    %147 = arith.addf %144, %146 : vector<16x1xf32>
    %148 = vector.broadcast %140 : vector<16x1xf32> to vector<16x8xf32>
    %149 = arith.mulf %148, %134 : vector<16x8xf32>
    %150 = arith.truncf %143 : vector<16x16xf32> to vector<16x16xbf16>
    %cst_46 = arith.constant dense<0.000000e+00> : vector<16x8xf32>
    %151 = tpu.matmul %150, %131, %cst_46 {dimension_numbers = #tpu.dot_dimension_numbers<[1], [0], [0], [1], [0, 0, 1, 1], [], []>} : vector<16x16xbf16>, vector<16x8xbf16>, vector<16x8xf32> -> vector<16x8xf32>
    %152 = arith.addf %149, %151 : vector<16x8xf32>
    %153 = tpu.reciprocal %147 {approx = true} : vector<16x1xf32> -> vector<16x1xf32>
    %154 = vector.broadcast %153 : vector<16x1xf32> to vector<16x8xf32>
    %155 = arith.mulf %152, %154 : vector<16x8xf32>
    %156 = tpu.concatenate %65, %95, %125, %155 in 1 : vector<16x8xf32>, vector<16x8xf32>, vector<16x8xf32>, vector<16x8xf32> -> vector<16x32xf32>
    %157 = arith.truncf %156 : vector<16x32xf32> to vector<16x32xbf16>
    %c0_47 = arith.constant 0 : index
    %c0_48 = arith.constant 0 : index
    %c0_49 = arith.constant 0 : index
    %158 = vector.load %arg7[%c0_47, %c0_48, %c0_49] : memref<1x32x32xbf16, #tpu.memory_space<vmem>>, vector<1x32x32xbf16>
    %159 = vector.shape_cast %158 : vector<1x32x32xbf16> to vector<32x32xbf16>
    %cst_50 = arith.constant dense<0.000000e+00> : vector<16x32xf32>
    %160 = tpu.matmul %157, %159, %cst_50 {dimension_numbers = #tpu.dot_dimension_numbers<[1], [0], [0], [1], [0, 0, 1, 1], [], []>} : vector<16x32xbf16>, vector<32x32xbf16>, vector<16x32xf32> -> vector<16x32xf32>
    %c0_51 = arith.constant 0 : index
    %c0_52 = arith.constant 0 : index
    %c0_53 = arith.constant 0 : index
    %161 = vector.load %arg8[%c0_51, %c0_52, %c0_53] : memref<1x1x32xf32, #tpu.memory_space<vmem>>, vector<1x1x32xf32>
    %162 = vector.shape_cast %161 : vector<1x1x32xf32> to vector<1x32xf32>
    %163 = vector.broadcast %162 : vector<1x32xf32> to vector<16x32xf32>
    %164 = arith.addf %160, %163 : vector<16x32xf32>
    %165 = arith.addf %3, %164 : vector<16x32xf32>
    %c0_54 = arith.constant 0 : index
    %c0_55 = arith.constant 0 : index
    %c0_56 = arith.constant 0 : index
    %166 = vector.load %arg9[%c0_54, %c0_55, %c0_56] : memref<1x1x32xf32, #tpu.memory_space<vmem>>, vector<1x1x32xf32>
    %167 = vector.shape_cast %166 : vector<1x1x32xf32> to vector<1x32xf32>
    %c0_57 = arith.constant 0 : index
    %c0_58 = arith.constant 0 : index
    %c0_59 = arith.constant 0 : index
    %168 = vector.load %arg10[%c0_57, %c0_58, %c0_59] : memref<1x1x32xf32, #tpu.memory_space<vmem>>, vector<1x1x32xf32>
    %169 = vector.shape_cast %168 : vector<1x1x32xf32> to vector<1x32xf32>
    %cst_60 = arith.constant dense<0.000000e+00> : vector<16xf32>
    %170 = vector.multi_reduction <add>, %165, %cst_60 [1] : vector<16x32xf32> to vector<16xf32>
    %171 = vector.shape_cast %170 : vector<16xf32> to vector<16x1xf32>
    %cst_61 = arith.constant 3.200000e+01 : f32
    %172 = vector.broadcast %cst_61 : f32 to vector<16x1xf32>
    %173 = arith.divf %171, %172 : vector<16x1xf32>
    %174 = vector.broadcast %173 : vector<16x1xf32> to vector<16x32xf32>
    %175 = arith.subf %165, %174 : vector<16x32xf32>
    %176 = arith.mulf %175, %175 : vector<16x32xf32>
    %cst_62 = arith.constant dense<0.000000e+00> : vector<16xf32>
    %177 = vector.multi_reduction <add>, %176, %cst_62 [1] : vector<16x32xf32> to vector<16xf32>
    %178 = vector.shape_cast %177 : vector<16xf32> to vector<16x1xf32>
    %cst_63 = arith.constant 3.200000e+01 : f32
    %179 = vector.broadcast %cst_63 : f32 to vector<16x1xf32>
    %180 = arith.divf %178, %179 : vector<16x1xf32>
    %cst_64 = arith.constant 9.99999974E-6 : f32
    %181 = vector.broadcast %cst_64 : f32 to vector<16x1xf32>
    %182 = arith.addf %180, %181 : vector<16x1xf32>
    %183 = math.rsqrt %182 : vector<16x1xf32>
    %184 = vector.broadcast %183 : vector<16x1xf32> to vector<16x32xf32>
    %185 = arith.mulf %175, %184 : vector<16x32xf32>
    %186 = vector.broadcast %167 : vector<1x32xf32> to vector<16x32xf32>
    %187 = arith.mulf %185, %186 : vector<16x32xf32>
    %188 = vector.broadcast %169 : vector<1x32xf32> to vector<16x32xf32>
    %189 = arith.addf %187, %188 : vector<16x32xf32>
    %190 = arith.truncf %189 : vector<16x32xf32> to vector<16x32xbf16>
    %c0_65 = arith.constant 0 : index
    %c0_66 = arith.constant 0 : index
    %c0_67 = arith.constant 0 : index
    %191 = vector.load %arg11[%c0_65, %c0_66, %c0_67] : memref<1x32x128xbf16, #tpu.memory_space<vmem>>, vector<1x32x128xbf16>
    %192 = vector.shape_cast %191 : vector<1x32x128xbf16> to vector<32x128xbf16>
    %cst_68 = arith.constant dense<0.000000e+00> : vector<16x128xf32>
    %193 = tpu.matmul %190, %192, %cst_68 {dimension_numbers = #tpu.dot_dimension_numbers<[1], [0], [0], [1], [0, 0, 1, 1], [], []>} : vector<16x32xbf16>, vector<32x128xbf16>, vector<16x128xf32> -> vector<16x128xf32>
    %c0_69 = arith.constant 0 : index
    %c0_70 = arith.constant 0 : index
    %c0_71 = arith.constant 0 : index
    %194 = vector.load %arg12[%c0_69, %c0_70, %c0_71] : memref<1x1x128xf32, #tpu.memory_space<vmem>>, vector<1x1x128xf32>
    %195 = vector.shape_cast %194 : vector<1x1x128xf32> to vector<1x128xf32>
    %196 = vector.broadcast %195 : vector<1x128xf32> to vector<16x128xf32>
    %197 = arith.addf %193, %196 : vector<16x128xf32>
    %cst_72 = arith.constant 5.000000e-01 : f32
    %198 = vector.broadcast %cst_72 : f32 to vector<16x128xf32>
    %199 = arith.mulf %198, %197 : vector<16x128xf32>
    %cst_73 = arith.constant 4.471500e-02 : f32
    %200 = vector.broadcast %cst_73 : f32 to vector<16x128xf32>
    %201 = arith.mulf %200, %197 : vector<16x128xf32>
    %202 = arith.mulf %201, %197 : vector<16x128xf32>
    %203 = arith.mulf %202, %197 : vector<16x128xf32>
    %204 = arith.addf %197, %203 : vector<16x128xf32>
    %cst_74 = arith.constant 0.797884583 : f32
    %205 = vector.broadcast %cst_74 : f32 to vector<16x128xf32>
    %206 = arith.mulf %205, %204 : vector<16x128xf32>
    %207 = math.tanh %206 : vector<16x128xf32>
    %cst_75 = arith.constant 1.000000e+00 : f32
    %208 = vector.broadcast %cst_75 : f32 to vector<16x128xf32>
    %209 = arith.addf %208, %207 : vector<16x128xf32>
    %210 = arith.mulf %199, %209 : vector<16x128xf32>
    %211 = arith.truncf %210 : vector<16x128xf32> to vector<16x128xbf16>
    %c0_76 = arith.constant 0 : index
    %c0_77 = arith.constant 0 : index
    %c0_78 = arith.constant 0 : index
    %212 = vector.load %arg13[%c0_76, %c0_77, %c0_78] : memref<1x128x32xbf16, #tpu.memory_space<vmem>>, vector<1x128x32xbf16>
    %213 = vector.shape_cast %212 : vector<1x128x32xbf16> to vector<128x32xbf16>
    %cst_79 = arith.constant dense<0.000000e+00> : vector<16x32xf32>
    %214 = tpu.matmul %211, %213, %cst_79 {dimension_numbers = #tpu.dot_dimension_numbers<[1], [0], [0], [1], [0, 0, 1, 1], [], []>} : vector<16x128xbf16>, vector<128x32xbf16>, vector<16x32xf32> -> vector<16x32xf32>
    %c0_80 = arith.constant 0 : index
    %c0_81 = arith.constant 0 : index
    %c0_82 = arith.constant 0 : index
    %215 = vector.load %arg14[%c0_80, %c0_81, %c0_82] : memref<1x1x32xf32, #tpu.memory_space<vmem>>, vector<1x1x32xf32>
    %216 = vector.shape_cast %215 : vector<1x1x32xf32> to vector<1x32xf32>
    %217 = vector.broadcast %216 : vector<1x32xf32> to vector<16x32xf32>
    %218 = arith.addf %214, %217 : vector<16x32xf32>
    %219 = arith.addf %165, %218 : vector<16x32xf32>
    %c0_83 = arith.constant 0 : index
    %c0_84 = arith.constant 0 : index
    %220 = vector.load %arg17[%c0_83, %c0_84] : memref<16x32xf32, #tpu.memory_space<vmem>>, vector<16x32xf32>
    tpu.vector_store %arg17[%c0_83, %c0_84], %219 {strides = array<i32>} : memref<16x32xf32, #tpu.memory_space<vmem>>, vector<16x32xf32>,
    %c1_i32 = arith.constant 1 : i32
    %221 = arith.cmpi eq, %arg1, %c1_i32 : i32
    %222 = arith.extui %221 : i1 to i32
    %c0_i32_85 = arith.constant 0 : i32
    %223 = arith.cmpi ne, %222, %c0_i32_85 : i32
    scf.if %223 {
      %c0_86 = arith.constant 0 : index
      %c0_87 = arith.constant 0 : index
      %224 = vector.load %arg15[%c0_86, %c0_87] : memref<1x32xf32, #tpu.memory_space<vmem>>, vector<1x32xf32>
      %c0_88 = arith.constant 0 : index
      %c0_89 = arith.constant 0 : index
      %225 = vector.load %arg16[%c0_88, %c0_89] : memref<1x32xf32, #tpu.memory_space<vmem>>, vector<1x32xf32>
      %cst_90 = arith.constant dense<0.000000e+00> : vector<16xf32>
      %226 = vector.multi_reduction <add>, %219, %cst_90 [1] : vector<16x32xf32> to vector<16xf32>
      %227 = vector.shape_cast %226 : vector<16xf32> to vector<16x1xf32>
      %cst_91 = arith.constant 3.200000e+01 : f32
      %228 = vector.broadcast %cst_91 : f32 to vector<16x1xf32>
      %229 = arith.divf %227, %228 : vector<16x1xf32>
      %230 = vector.broadcast %229 : vector<16x1xf32> to vector<16x32xf32>
      %231 = arith.subf %219, %230 : vector<16x32xf32>
      %232 = arith.mulf %231, %231 : vector<16x32xf32>
      %cst_92 = arith.constant dense<0.000000e+00> : vector<16xf32>
      %233 = vector.multi_reduction <add>, %232, %cst_92 [1] : vector<16x32xf32> to vector<16xf32>
      %234 = vector.shape_cast %233 : vector<16xf32> to vector<16x1xf32>
      %cst_93 = arith.constant 3.200000e+01 : f32
      %235 = vector.broadcast %cst_93 : f32 to vector<16x1xf32>
      %236 = arith.divf %234, %235 : vector<16x1xf32>
      %cst_94 = arith.constant 9.99999974E-6 : f32
      %237 = vector.broadcast %cst_94 : f32 to vector<16x1xf32>
      %238 = arith.addf %236, %237 : vector<16x1xf32>
      %239 = math.rsqrt %238 : vector<16x1xf32>
      %240 = vector.broadcast %239 : vector<16x1xf32> to vector<16x32xf32>
      %241 = arith.mulf %231, %240 : vector<16x32xf32>
      %242 = vector.broadcast %224 : vector<1x32xf32> to vector<16x32xf32>
      %243 = arith.mulf %241, %242 : vector<16x32xf32>
      %244 = vector.broadcast %225 : vector<1x32xf32> to vector<16x32xf32>
      %245 = arith.addf %243, %244 : vector<16x32xf32>
      %c0_95 = arith.constant 0 : index
      %c0_96 = arith.constant 0 : index
      %246 = vector.load %arg17[%c0_95, %c0_96] : memref<16x32xf32, #tpu.memory_space<vmem>>, vector<16x32xf32>
      tpu.vector_store %arg17[%c0_95, %c0_96], %245 {strides = array<i32>} : memref<16x32xf32, #tpu.memory_space<vmem>>, vector<16x32xf32>,
    } else {
    }
    return
  }
  func.func @transform_0(%arg0: i32, %arg1: i32) -> (i32, i32) {
    %c0_i32 = arith.constant 0 : i32
    %c0_i32_0 = arith.constant 0 : i32
    return %arg0, %c0_i32 : i32, i32
  }
  func.func @transform_1(%arg0: i32, %arg1: i32) -> (i32, i32, i32) {
    %c0_i32 = arith.constant 0 : i32
    %c0_i32_0 = arith.constant 0 : i32
    %c0_i32_1 = arith.constant 0 : i32
    return %arg1, %c0_i32, %c0_i32_0 : i32, i32, i32
  }
  func.func @transform_2(%arg0: i32, %arg1: i32) -> (i32, i32, i32) {
    %c0_i32 = arith.constant 0 : i32
    %c0_i32_0 = arith.constant 0 : i32
    %c0_i32_1 = arith.constant 0 : i32
    return %arg1, %c0_i32, %c0_i32_0 : i32, i32, i32
  }
  func.func @transform_3(%arg0: i32, %arg1: i32) -> (i32, i32, i32) {
    %c0_i32 = arith.constant 0 : i32
    %c0_i32_0 = arith.constant 0 : i32
    %c0_i32_1 = arith.constant 0 : i32
    return %arg1, %c0_i32, %c0_i32_0 : i32, i32, i32
  }
  func.func @transform_4(%arg0: i32, %arg1: i32) -> (i32, i32, i32) {
    %c0_i32 = arith.constant 0 : i32
    %c0_i32_0 = arith.constant 0 : i32
    %c0_i32_1 = arith.constant 0 : i32
    return %arg1, %c0_i32, %c0_i32_0 : i32, i32, i32
  }
  func.func @transform_5(%arg0: i32, %arg1: i32) -> (i32, i32, i32) {
    %c0_i32 = arith.constant 0 : i32
    %c0_i32_0 = arith.constant 0 : i32
    %c0_i32_1 = arith.constant 0 : i32
    return %arg1, %c0_i32, %c0_i32_0 : i32, i32, i32
  }
  func.func @transform_6(%arg0: i32, %arg1: i32) -> (i32, i32, i32) {
    %c0_i32 = arith.constant 0 : i32
    %c0_i32_0 = arith.constant 0 : i32
    %c0_i32_1 = arith.constant 0 : i32
    return %arg1, %c0_i32, %c0_i32_0 : i32, i32, i32
  }
  func.func @transform_7(%arg0: i32, %arg1: i32) -> (i32, i32, i32) {
    %c0_i32 = arith.constant 0 : i32
    %c0_i32_0 = arith.constant 0 : i32
    %c0_i32_1 = arith.constant 0 : i32
    return %arg1, %c0_i32, %c0_i32_0 : i32, i32, i32
  }
  func.func @transform_8(%arg0: i32, %arg1: i32) -> (i32, i32, i32) {
    %c0_i32 = arith.constant 0 : i32
    %c0_i32_0 = arith.constant 0 : i32
    %c0_i32_1 = arith.constant 0 : i32
    return %arg1, %c0_i32, %c0_i32_0 : i32, i32, i32
  }
  func.func @transform_9(%arg0: i32, %arg1: i32) -> (i32, i32, i32) {
    %c0_i32 = arith.constant 0 : i32
    %c0_i32_0 = arith.constant 0 : i32
    %c0_i32_1 = arith.constant 0 : i32
    return %arg1, %c0_i32, %c0_i32_0 : i32, i32, i32
  }
  func.func @transform_10(%arg0: i32, %arg1: i32) -> (i32, i32, i32) {
    %c0_i32 = arith.constant 0 : i32
    %c0_i32_0 = arith.constant 0 : i32
    %c0_i32_1 = arith.constant 0 : i32
    return %arg1, %c0_i32, %c0_i32_0 : i32, i32, i32
  }
  func.func @transform_11(%arg0: i32, %arg1: i32) -> (i32, i32, i32) {
    %c0_i32 = arith.constant 0 : i32
    %c0_i32_0 = arith.constant 0 : i32
    %c0_i32_1 = arith.constant 0 : i32
    return %arg1, %c0_i32, %c0_i32_0 : i32, i32, i32
  }
  func.func @transform_12(%arg0: i32, %arg1: i32) -> (i32, i32, i32) {
    %c0_i32 = arith.constant 0 : i32
    %c0_i32_0 = arith.constant 0 : i32
    %c0_i32_1 = arith.constant 0 : i32
    return %arg1, %c0_i32, %c0_i32_0 : i32, i32, i32
  }
  func.func @transform_13(%arg0: i32, %arg1: i32) -> (i32, i32) {
    %c0_i32 = arith.constant 0 : i32
    %c0_i32_0 = arith.constant 0 : i32
    %c0_i32_1 = arith.constant 0 : i32
    return %c0_i32, %c0_i32_0 : i32, i32
  }
  func.func @transform_14(%arg0: i32, %arg1: i32) -> (i32, i32) {
    %c0_i32 = arith.constant 0 : i32
    %c0_i32_0 = arith.constant 0 : i32
    %c0_i32_1 = arith.constant 0 : i32
    return %c0_i32, %c0_i32_0 : i32, i32
  }
  func.func @transform_15(%arg0: i32, %arg1: i32) -> (i32, i32) {
    %c0_i32 = arith.constant 0 : i32
    %c0_i32_0 = arith.constant 0 : i32
    return %arg0, %c0_i32 : i32, i32
  }
}

</mosaic_0001>

<bundles_post_ra>
// kernel: image_encoder_vit_forward.2
= control target key start
LH: loop header
LB: loop body
LE: loop exit
PB: predicated region body
PF: predicated region fallthrough
CT: control target
= control target key end

     0   :  { %s559_s15 = smov 0   ;;  %s561_s16 = smov 0   ;;  %s613_s0 = inlined_call_operand.vmem [shape: bf16[32,64], index: 0, kind: input, shape index: {}]   ;;  %s614_s1 = inlined_call_operand.vmem [shape: bf16[64,32], index: 1, kind: input, shape index: {}]   ;;  %s615_s2 = inlined_call_operand.vmem [shape: f32[1,32], index: 2, kind: input, shape index: {}]   ;;  %s616_s3 = inlined_call_operand.vmem [shape: f32[16,32], index: 3, kind: input, shape index: {}]   ;;  %s617_s4 = inlined_call_operand.vmem [shape: bf16[32,32], index: 4, kind: output, shape index: {}]  }
   0x1   :  { %s563_s17 = smov 0  }
   0x2 LB: > { %s26_s18 = sadd.s32 1, %s526_s16  ;;  %p442_p0 = scmp.ge.s32.totalorder %s530_s17, 1  ;;  %s530_s17 = sphi %s563_s17, %s14_s17   ;;  %s526_s16 = sphi %s561_s16, %s619_s16   ;;  %s522_s15 = sphi %s559_s15, %s618_s15  }
   0x3   : > { %p28_p1 = scmp.ge.s32.totalorder %s26_s18, 2  ;;  %p192_p2 = scmp.lt.s32.totalorder %s530_s17, 3 }
   0x5   : > { %s621_s18 = smov (%p28_p1, %s26_s18), 0  ;;  %p193_p3 = pnand %p442_p0, %p192_p2 }
   0x6   : > { %s443_s23 = sshll.u32 (!%p193_p3), %s522_s15, 1 }
   0x7   : > { %196 = sbr.rel (%p193_p3) target bundleno = 233 (0xe9), region = 36  ;;  %p227_p4 = scmp.lt.s32.totalorder (!%p193_p3), %s443_s23, 3 }
   0xc   : > { %v503_v0 = vld [vmem:[%s614_s1 + $0x18] sm:$0xff]   ;;  %v532_v1 = vmov 0.0   ;;  %v504_v2 = vld [vmem:[%s614_s1 + $0x10] sm:$0xff]   ;;  %vm533_vm0 = vmmov 0   ;;  %s623_s23 = smov (!%p227_p4, %s443_s23), 3  ;;  %v505_v3 = vld [vmem:[%s614_s1 + $0x8] sm:$0xff]  }
   0xd   : > { %465 = vmatprep.subr.bf16.mxu0 %v532_v1  ;;  %473 = vmatprep.mubr.msk.bf16.mxu0 %vm533_vm0, %v532_v1  ;;  %s444_s26 = sshll.u32 %s623_s23, 2  ;;  %v506_v4 = vld [vmem:[%s614_s1] sm:$0xff]   ;;  %vm294_vm1 = vcmask 523264   ;;  %vm351_vm2 = vcmask 257024   ;;  %v340_v13 = vld [vmem:[%s616_s3 + $0x8] sm:$0xff] }
   0xe   : > { %466 = vmatpush3.bf16.msra.mxu0 %v503_v0  ;;  %s230_s29 = scalar_lea.vmem %s613_s0, %s444_s26  ;;  %v447_v6 = vld [vmem:[%s615_s2] ss:$0 sm:$0xff]  ;;  %s244_s12 = scalar_lea.vmem %s617_s4, %s444_s26 }
   0xf   : > { %467 = vmatprep.subr.bf16.mxu0 %v532_v1  ;;  %v507_v5 = vld [vmem:[%s230_s29] sm:$0xff]  }
  0x10   : > { %v339_v8 = vld [vmem:[%s616_s3] sm:$0xff] }
  0x12   : > { %468 = vmatpush3.bf16.msra.mxu0 %v504_v2 }
  0x13   : > { %469 = vmatprep.subr.bf16.mxu0 %v532_v1 }
  0x16   : > { %470 = vmatpush3.bf16.msra.mxu0 %v505_v3 }
  0x17   : > { %471 = vmatprep.subr.bf16.mxu0 %v532_v1 }
  0x1a   : > { %472 = vmatpush3.bf16.msra.mxu0 %v506_v4 }
  0x1d   : > { %474 = vmatmul.mubr.msk.bf16.vlgmr.msra.gmra.mxu0 %vm294_vm1, %v507_v5 }
  0xdd   : > { %v332_v7 = vpop.f32.mrf.mxu0 }
  0xde   : > { %v333_v9 = vadd.f32 %v447_v6, %v332_v7 }
  0xdf   : > { %v475_v10 = vpop.f32.mrf.mxu0 }
  0xe0   : > { %v341_v11 = vadd.f32 %v339_v8, %v333_v9 }
  0xe1   : > { %v335_v12 = vpop.f32.mrf.mxu0 }
  0xe2   : > { %v458_v14 = vpack.c.bf16 %v341_v11, %v341_v11  ;;  %v336_v15 = vadd.f32 %v447_v6, %v335_v12 }
  0xe3   : > { %v476_v16 = vpop.f32.mrf.mxu0 }
  0xe4   : > { %352 = vst.msk [vmem:[%s244_s12] sm:$0xf] %vm351_vm2, %v458_v14  ;;  %v342_v17 = vadd.f32 %v340_v13, %v336_v15 }
  0xe6   : > { %v459_v18 = vpack.c.bf16 %v342_v17, %v342_v17 }
  0xe8   : > { %353 = vst.msk [vmem:[%s244_s12 + $0x4] sm:$0xf] %vm351_vm2, %v459_v18 }
  0xe9 PF: > { %s14_s17 = sadd.s32 1, %s530_s17   ;;  %s618_s15 = smov %s526_s16 }
  0xea   : > { %p11_p5 = scmp.ge.s32.totalorder %s14_s17, 4   ;;  %s619_s16 = smov %s621_s18 }
  0xec   :  { %13 = sbr.rel (!%p11_p5) target bundleno = 2 (0x2), region = 69 }

// kernel: image_encoder_vit_forward.3
= control target key start
LH: loop header
LB: loop body
LE: loop exit
PB: predicated region body
PF: predicated region fallthrough
CT: control target
= control target key end

     0   :  { %s2981_s0 = inlined_call_operand.vmem [shape: bf16[32,32], index: 0, kind: input, shape index: {}]   ;;  %s2982_s1 = inlined_call_operand.vmem [shape: f32[2,1,32], index: 1, kind: input, shape index: {}]   ;;  %s2983_s2 = inlined_call_operand.vmem [shape: f32[2,1,32], index: 2, kind: input, shape index: {}]   ;;  %s2984_s3 = inlined_call_operand.vmem [shape: bf16[2,32,96], index: 3, kind: input, shape index: {}]   ;;  %s2985_s4 = inlined_call_operand.vmem [shape: f32[2,1,96], index: 4, kind: input, shape index: {}]   ;;  %s2986_s5 = inlined_call_operand.vmem [shape: bf16[2,32,32], index: 5, kind: input, shape index: {}]   ;;  %s2987_s6 = inlined_call_operand.vmem [shape: f32[2,1,32], index: 6, kind: input, shape index: {}]   ;;  %s2988_s7 = inlined_call_operand.vmem [shape: f32[2,1,32], index: 7, kind: input, shape index: {}]   ;;  %s2989_s8 = inlined_call_operand.vmem [shape: f32[2,1,32], index: 8, kind: input, shape index: {}]   ;;  %s2990_s9 = inlined_call_operand.vmem [shape: bf16[2,32,128], index: 9, kind: input, shape index: {}]   ;;  %s2991_s10 = inlined_call_operand.vmem [shape: f32[2,1,128], index: 10, kind: input, shape index: {}]   ;;  %s2992_s11 = inlined_call_operand.vmem [shape: bf16[2,128,32], index: 11, kind: input, shape index: {}]   ;;  %s2993_s12 = inlined_call_operand.vmem [shape: f32[2,1,32], index: 12, kind: input, shape index: {}]   ;;  %s2994_s13 = inlined_call_operand.vmem [shape: f32[1,32], index: 13, kind: input, shape index: {}]   ;;  %s2995_s14 = inlined_call_operand.vmem [shape: f32[1,32], index: 14, kind: input, shape index: {}]   ;;  %s2996_s15 = inlined_call_operand.hbm [shape: f32[32,32], index: 15, kind: output, shape index: {}]  }
   0x1   :  { %3012 = sst [smem:[#allocation18_spill]] %s2981_s0 }
   0x2   :  { %3013 = sst [smem:[#allocation19_spill]] %s2984_s3 }
   0x3   :  { %3014 = sst [smem:[#allocation20_spill]] %s2986_s5 }
   0x4   :  { %3015 = sst [smem:[#allocation21_spill]] %s2988_s7 }
   0x5   :  { %3016 = sst [smem:[#allocation22_spill]] %s2992_s11 }
   0x6   :  { %3017 = sst [smem:[#allocation23_spill]] %s2994_s13 }
   0x7   :  { %3018 = sst [smem:[#allocation24_spill]] %s2995_s14 }
   0x8   :  { %3019 = sst [smem:[#allocation25_spill]] %s2996_s15 }
   0x9   :  { %20 = vsyncpa [#allocation3], 0 }
   0xa   :  { %22 = vsyncpa [#allocation3 + $0x1], 0  ;;  %s2533_s18 = smov 0   ;;  %s2535_s19 = smov 0  }
   0xb   :  { %s2537_s20 = smov 0   ;;  %s2539_s21 = smov 0  }
   0xc   :  { %s2541_s22 = smov 0   ;;  %s2543_s23 = smov 0  }
   0xd   :  { %s2545_s24 = smov 0   ;;  %s2547_s25 = smov 0  }
   0xe LB: > { %3020 = sst [smem:[#allocation5_spill]] %s2405_s18  ;;  %s1967_s26 = sadd.s32 4294967295, %s2433_s25   ;;  %s2433_s25 = sphi %s2547_s25, %s28_s25   ;;  %s2429_s24 = sphi %s2545_s24, %s3064_s24   ;;  %s2425_s23 = sphi %s2543_s23, %s3063_s23   ;;  %s2421_s22 = sphi %s2541_s22, %s3062_s22   ;;  %s2417_s21 = sphi %s2539_s21, %s3061_s21   ;;  %s2413_s20 = sphi %s2537_s20, %s3060_s20   ;;  %s2409_s19 = sphi %s2535_s19, %s3059_s19   ;;  %s2405_s18 = sphi %s2533_s18, %s3058_s18  }
   0xf   : > { %3021 = sst [smem:[#allocation6_spill]] %s2409_s19  ;;  %s1968_s27 = sadd.s32 4294967294, %s2433_s25  }
  0x10   : > { %3022 = sst [smem:[#allocation7_spill]] %s2413_s20  ;;  %s37_s28 = sadd.s32 1, %s2425_s23 }
  0x11   : > { %3023 = sst [smem:[#allocation8_spill]] %s2417_s21  ;;  %p38_p0 = scmp.ge.s32.totalorder %s37_s28, 2 }
  0x12   : > { %3024 = sst [smem:[#allocation9_spill]] %s2421_s22  ;;  %s40_s29 = sadd.s32 1, %s2429_s24 }
  0x13   : > { %3025 = sst [smem:[#allocation10_spill]] %s2425_s23  ;;  %p437_p1 = scmp.ne.s32.totalorder %s2413_s20, %s2409_s19 }
  0x14   : > { %3026 = sst [smem:[#allocation11_spill]] %s2429_s24  ;;  %p438_p2 = scmp.eq.s32.totalorder %s1967_s26, 3 }
  0x15   : > { %3027 = sst [smem:[#allocation12_spill]] %s2433_s25  ;;  %s3066_s28 = smov (%p38_p0, %s37_s28), 0 }
  0x16   : > { %3028 = sst [smem:[#allocation13_spill]] %s3066_s28  ;;  %s3068_s29 = smov (!%p38_p0, %s40_s29), %s2429_s24 }
  0x17   : > { %p2582_p3 = por %p438_p2, %p437_p1  ;;  %p443_p4 = scmp.ne.s32.totalorder %s2409_s19, %s2405_s18 }
  0x18   : > { %p42_p5 = scmp.ge.s32.totalorder %s3068_s29, 2  ;;  %p444_p6 = scmp.eq.s32.totalorder %s1968_s27, 3 }
  0x19   : > { %s3029_s30 = scalar_select %p2582_p3, 1, 0 }
  0x1a   : > { %p1971_p7 = scmp.ge.s32.totalorder %s2433_s25, 1  ;;  %p557_p8 = scmp.lt.s32.totalorder %s2433_s25, 5 }
  0x1b   : > { %3030 = sst [smem:[#allocation14_spill]] %s3029_s30  ;;  %s3070_s29 = smov (%p42_p5, %s3068_s29), 0 }
  0x1c   : > { %3031 = sst [smem:[#allocation15_spill]] %s3070_s29  ;;  %p2592_p9 = por %p444_p6, %p443_p4 }
  0x1d   : > { %p558_p10 = pnand %p1971_p7, %p557_p8  ;;  %s424_s17 = ssub.s32 %s2429_s24, %s3070_s29 }
  0x1e   : > { %s3032_s16 = scalar_select %p2592_p9, 1, 0 }
  0x1f   : > { %s427_s26 = sadd.s32 1, %s2413_s20  ;;  %p425_p11 = scmp.eq.s32.totalorder %s424_s17, 0 }
  0x20   : > { %3033 = sst [smem:[#allocation16_spill]] %s3032_s16  ;;  %561 = sbr.rel (%p558_p10) target bundleno = 2724 (0xaa4), region = 80 }
  0x21   : > { %s2600_s28 = scalar_select %p425_p11, %s2413_s20, %s427_s26  }
  0x22   : > { %s3001_s27 = sand.u32 (!%p558_p10), 1, %s2409_s19   ;;  %s1973_s23 = sshll.u32 (!%p558_p10), %s2421_s22, 1 }
  0x23   : > { %3034 = sst [smem:[#allocation17_spill]] %s2600_s28  ;;  %s1972_s18 = sshll.u32 (!%p558_p10), %s3001_s27, 4 }
  0x24   : > { %p650_p12 = scmp.lt.s32.totalorder (!%p558_p10), %s1973_s23, 3  ;;  %p655_p13 = scmp.lt.s32.totalorder (!%p558_p10), %s2417_s21, 1 }
  0x25   : > { %s3035_s0 = sld [smem:[#allocation18_spill]]  ;;  %s2667_s14 = scalar_lea.vmem [#allocation2], %s1972_s18 }
  0x26   : > { %s3072_s23 = smov (!%p650_p12, %s1973_s23), 3  ;;  %s3036_s3 = sld [smem:[#allocation19_spill]] }
  0x27   : > { %s2608_s16 = scalar_select %p655_p13, %s2417_s21, 1 }
  0x28   : > { %s1974_s17 = sshll.u32 %s3072_s23, 2  ;;  %s3037_s5 = sld [smem:[#allocation20_spill]] }
  0x29   : > { %s2025_s19 = sshll.u32 %s2608_s16, 4  ;;  %s690_s11 = scalar_lea.vmem %s2991_s10, %s2608_s16 }
  0x2a   : > { %s2651_s23 = scalar_lea.vmem %s2990_s9, %s2025_s19  ;;  %s698_s15 = scalar_lea.vmem %s2993_s12, %s2608_s16 }
  0x2b   : > { %s653_s27 = scalar_lea.vmem %s3035_s0, %s1974_s17  ;;  %s682_s0 = scalar_lea.vmem %s2989_s8, %s2608_s16 }
  0x2c   : > { %s2625_s13 = scalar_lea.vmem %s3036_s3, %s2025_s19  ;;  %s3039_s20 = sld [smem:[#allocation22_spill]] }
  0x2d   : > { %s3040_s22 = sld [smem:[#allocation8_spill]] }
  0x2e   : > { %s2634_s26 = scalar_lea.vmem %s3037_s5, %s2025_s19  ;;  %s2028_s5 = sshll.u32 %s2608_s16, 6 }
  0x32   : > { %s2665_s7 = scalar_lea.vmem %s3039_s20, %s2028_s5 }
  0x33   : > { %p1983_p0 = scmp.ne.s32.totalorder %s3040_s22, 0 }
  0x35   : > { %704 = sbr.rel (%p1983_p0) target bundleno = 62 (0x3e), region = 84 }
  0x3a   : > { %v2031_v0 = vld [vmem:[%s653_s27] sm:$0xff]   ;;  %vm709_vm0 = vcmask 261120  }
  0x3b   : > { %v2032_v1 = vunpack.c.l.bf16 %v2031_v0  ;;  %v2033_v2 = vunpack.c.h.bf16 %v2031_v0 }
  0x3d   : > { %710 = vst.msk [vmem:[%s2667_s14] sm:$0xff] %vm709_vm0, %v2032_v1  ;;  %711 = vst.msk [vmem:[%s2667_s14 + $0x8] sm:$0xff] %vm709_vm0, %v2033_v2 }
  0x3e PF: > { %vm716_vm1 = vcmask 261120   ;;  %v2263_v17 = vld [vmem:[%s2625_s13 + $0x8] sm:$0xff]   ;;  %v2435_v18 = vmov 0.0   ;;  %vm2436_vm2 = vmmov 0   ;;  %v2264_v19 = vld [vmem:[%s2625_s13] sm:$0xff]   ;;  %s3041_s13 = scalar_lea.vmem %s2982_s1, %s2608_s16  ;;  %s3042_s20 = scalar_lea.vmem %s2983_s2, %s2608_s16  ;;  %vm832_vm3 = vcmask 64512  }
  0x3f   : > { %2068 = vmatprep.subr.bf16.mxu0 %v2435_v18  ;;  %2072 = vmatprep.mubr.msk.bf16.mxu0 %vm2436_vm2, %v2435_v18  ;;  %v1984_v28 = vld [vmem:[%s3041_s13] ss:$0 sm:$0xff]  ;;  %s3043_s29 = scalar_lea.vmem %s2985_s4, %s2608_s16  ;;  %s2437_s17 = smov 88   ;;  %vm880_vm4 = vcmask 130048   ;;  %vm1390_vm5 = vcmask 195584  }
  0x40   : > { %2069 = vmatpush3.bf16.msra.mxu0 %v2263_v17  ;;  %2088 = vmatprep.subr.bf16.mxu1 %v2435_v18  ;;  %v1985_v32 = vld [vmem:[%s3042_s20] ss:$0 sm:$0xff]  ;;  %s2438_s24 = smov 96   ;;  %s2439_s28 = smov 120  }
  0x41   : > { %2070 = vmatprep.subr.bf16.mxu0 %v2435_v18  ;;  %2090 = vmatprep.mubr.msk.bf16.mxu1 %vm2436_vm2, %v2435_v18  ;;  %v1986_v38 = vld [vmem:[%s3043_s29] ss:$0 sm:$0xff]  ;;  %s2440_s30 = smov 112   ;;  %s2441_s25 = smov 80  }
  0x42   : > { %s2442_s22 = smov 104   ;;  %s2443_s3 = smov 72  }
  0x43   : > { %s2444_s5 = smov 64   ;;  %s2445_s13 = smov 56  }
  0x44   : > { %v2673_v3 = vld [vmem:[%s2667_s14] sm:$0xff]  ;;  %v2676_v4 = vld [vmem:[%s2667_s14 + $0x8] sm:$0xff]  ;;  %2071 = vmatpush3.bf16.msra.mxu0 %v2264_v19  ;;  %s2446_s18 = smov 48   ;;  %s2447_s19 = smov 40  }
  0x45   : > { %v717_v5 = vsel %vm716_vm1, %v2673_v3, 0.0  ;;  %v720_v6 = vsel %vm716_vm1, %v2676_v4, 0.0  ;;  %2076 = vmatprep.subr.bf16.mxu0 %v2435_v18  ;;  %s2448_s20 = smov 8   ;;  %s2449_s27 = smov 16  }
  0x46   : > { %718 = vadd.xlane.f32.xlu0 %v717_v5  ;;  %s2450_s21 = smov 24  }
  0x4a   : > { %721 = vadd.xlane.f32.xlu0 %v720_v6 }
  0xcf   : > { %v719_v7 = vpop.xlane.xlu0 %718 }
  0xd0   : > { %v724_v8 = vmul.f32 0.03125, %v719_v7 }
  0xd2   : > { %v726_v9 = vsub.f32 %v2673_v3, %v724_v8 }
  0xd3   : > { %v722_v10 = vpop.xlane.xlu0 %721 }
  0xd4   : > { %v725_v11 = vmul.f32 0.03125, %v722_v10  ;;  %v728_v12 = vmul.f32 %v726_v9, %v726_v9 }
  0xd6   : > { %v727_v13 = vsub.f32 %v2676_v4, %v725_v11  ;;  %v730_v14 = vsel %vm716_vm1, %v728_v12, 0.0 }
  0xd7   : > { %731 = vadd.xlane.f32.xlu1 %v730_v14 }
  0xd8   : > { %v729_v15 = vmul.f32 %v727_v13, %v727_v13 }
  0xda   : > { %v733_v16 = vsel %vm716_vm1, %v729_v15, 0.0 }
  0xdb   : > { %734 = vadd.xlane.f32.xlu1 %v733_v16 }
 0x160   : > { %v732_v20 = vpop.xlane.xlu1 %731 }
 0x161   : > { %v736_v21 = vmul.f32 0.03125, %v732_v20 }
 0x163   : > { %v738_v22 = vadd.f32 1e-05, %v736_v21 }
 0x164   : > { %v735_v23 = vpop.xlane.xlu1 %734 }
 0x165   : > { %2277 = vrsqrt.f32 %v738_v22  ;;  %v737_v24 = vmul.f32 0.03125, %v735_v23 }
 0x167   : > { %v739_v25 = vadd.f32 1e-05, %v737_v24 }
 0x169   : > { %2279 = vrsqrt.f32 %v739_v25 }
 0x172   : > { %v2278_v26 = vpop.eup %2277 }
 0x173   : > { %v742_v27 = vmul.f32 %v2278_v26, %v726_v9 }
 0x175   : > { %v750_v31 = vmul.f32 %v1984_v28, %v742_v27 }
 0x176   : > { %v2280_v29 = vpop.eup %2279 }
 0x177   : > { %v743_v30 = vmul.f32 %v2280_v29, %v727_v13  ;;  %v758_v34 = vadd.f32 %v1985_v32, %v750_v31 }
 0x179   : > { %v751_v33 = vmul.f32 %v1984_v28, %v743_v30 }
 0x17b   : > { %v759_v35 = vadd.f32 %v1985_v32, %v751_v33 }
 0x17d   : > { %v760_v36 = vpack.c.bf16 %v759_v35, %v758_v34 }
 0x17f   : > { %2073 = vmatmul.mubr.msk.bf16.vlgmr.msra.gmra.mxu0 %vm716_vm1, %v760_v36 }
 0x180   : > { %2078 = vmatprep.mubr.msk.bf16.mxu0 %vm2436_vm2, %v2435_v18 }
 0x23f   : > { %v821_v37 = vpop.f32.mrf.mxu0 }
 0x240   : > { %v822_v41 = vadd.f32 %v1986_v38, %v821_v37 }
 0x241   : > { %v2074_v39 = vpop.f32.mrf.mxu0 }
 0x243   : > { %v824_v40 = vpop.f32.mrf.mxu0 }
 0x244   : > { %v825_v42 = vadd.f32 %v1986_v38, %v824_v40 }
 0x245   : > { %v2075_v43 = vpop.f32.mrf.mxu0 }
 0x246   : > { %v2714_v44 = vpack.c.bf16 %v825_v42, %v822_v41 }
 0x248   : > { %965 = vrot.lane.b32.xlu1 %v2714_v44, %s2437_s17  ;;  %830 = vrot.lane.b32.xlu0 %v2714_v44, %s2438_s24  ;;  %s3044_s17 = scalar_lea.vmem %s2987_s6, %s2608_s16 }
 0x24c   : > { %963 = vrot.lane.b32.xlu1 %v2714_v44, %s2439_s28  ;;  %1096 = vrot.lane.b32.xlu0 %v2714_v44, %s2440_s30  ;;  %s3045_s30 = sld [smem:[#allocation21_spill]] }
 0x250   : > { %1098 = vrot.lane.b32.xlu1 %v2714_v44, %s2441_s25  ;;  %1229 = vrot.lane.b32.xlu0 %v2714_v44, %s2442_s22 }
 0x254   : > { %1231 = vrot.lane.b32.xlu1 %v2714_v44, %s2443_s3 }
 0x2ba   : > { %v966_v45 = vpop.permute.xlu1 %965  ;;  %v831_v46 = vpop.permute.xlu0 %830 }
 0x2bb   : > { %v837_v47 = vsel %vm832_vm3, %v831_v46, 0  ;;  %v971_v48 = vsel %vm832_vm3, %v966_v45, 0 }
 0x2bc   : > { %2077 = vmatpush3.bf16.xpose.msra.mxu0 %v837_v47  ;;  %2089 = vmatpush3.bf16.xpose.msra.mxu1 %v971_v48 }
 0x2bd   : > { %2100 = vmatprep.subr.bf16.mxu1 %v2435_v18  ;;  %2082 = vmatprep.subr.bf16.mxu0 %v2435_v18 }
 0x2be   : > { %v964_v49 = vpop.permute.xlu1 %963  ;;  %v1097_v53 = vpop.permute.xlu0 %1096 }
 0x2c2   : > { %v1099_v50 = vpop.permute.xlu1 %1098  ;;  %v1230_v55 = vpop.permute.xlu0 %1229 }
 0x2c3   : > { %v1104_v51 = vsel %vm832_vm3, %v1099_v50, 0  ;;  %2079 = vmatmul.mubr.msk.bf16.vlgmr.msra.gmra.mxu0 %vm832_vm3, %v2714_v44  ;;  %2091 = vmatmul.mubr.msk.bf16.vlgmr.msra.gmra.mxu1 %vm832_vm3, %v964_v49 }
 0x2c4   : > { %2101 = vmatpush3.bf16.xpose.msra.mxu1 %v1104_v51  ;;  %2102 = vmatprep.mubr.msk.bf16.mxu1 %vm2436_vm2, %v2435_v18 }
 0x2c5   : > { %2112 = vmatprep.subr.bf16.mxu1 %v2435_v18  ;;  %2084 = vmatprep.mubr.msk.bf16.mxu0 %vm2436_vm2, %v2435_v18 }
 0x2c6   : > { %v1232_v52 = vpop.permute.xlu1 %1231 }
 0x2c7   : > { %v1237_v54 = vsel %vm832_vm3, %v1232_v52, 0 }
 0x2cb   : > { %2103 = vmatmul.mubr.msk.bf16.vlgmr.msra.gmra.mxu1 %vm832_vm3, %v1097_v53 }
 0x2cc   : > { %2113 = vmatpush3.bf16.xpose.msra.mxu1 %v1237_v54  ;;  %2114 = vmatprep.mubr.msk.bf16.mxu1 %vm2436_vm2, %v2435_v18 }
 0x2cd   : > { %2124 = vmatprep.subr.bf16.mxu1 %v2435_v18 }
 0x2d3   : > { %2115 = vmatmul.mubr.msk.bf16.vlgmr.msra.gmra.mxu1 %vm832_vm3, %v1230_v55 }
 0x2d4   : > { %2128 = vmatprep.mubr.msk.bf16.mxu1 %vm2436_vm2, %v2435_v18 }
 0x383   : > { %v873_v56 = vpop.f32.mrf.mxu0  ;;  %v1007_v57 = vpop.f32.mrf.mxu1 }
 0x384   : > { %v1014_v58 = vsel %vm880_vm4, %v1007_v57, -inf  ;;  %v881_v59 = vsel %vm880_vm4, %v873_v56, -inf }
 0x385   : > { %v2092_v60 = vpop.f32.mrf.mxu1  ;;  %1015 = vmax.xlane.f32.xlu0 %v1014_v58  ;;  %882 = vmax.xlane.f32.xlu1 %v881_v59  ;;  %v2080_v61 = vpop.f32.mrf.mxu0 }
 0x387   : > { %v876_v62 = vpop.f32.mrf.mxu0  ;;  %v1010_v63 = vpop.f32.mrf.mxu1 }
 0x388   : > { %v884_v0 = vsel %vm880_vm4, %v876_v62, -inf  ;;  %v1017_v6 = vsel %vm880_vm4, %v1010_v63, -inf }
 0x389   : > { %v2093_v1 = vpop.f32.mrf.mxu1  ;;  %885 = vmax.xlane.f32.xlu0 %v884_v0  ;;  %v2081_v2 = vpop.f32.mrf.mxu0 }
 0x38b   : > { %v2747_v5 = vpop.f32.mrf.mxu1 }
 0x38c   : > { %v1147_v16 = vsel %vm880_vm4, %v2747_v5, -inf }
 0x38d   : > { %v2104_v7 = vpop.f32.mrf.mxu1  ;;  %1018 = vmax.xlane.f32.xlu0 %v1017_v6 }
 0x38f   : > { %v1143_v8 = vpop.f32.mrf.mxu1 }
 0x390   : > { %v1150_v9 = vsel %vm880_vm4, %v1143_v8, -inf }
 0x391   : > { %v2105_v10 = vpop.f32.mrf.mxu1  ;;  %1151 = vmax.xlane.f32.xlu0 %v1150_v9 }
 0x393   : > { %v2751_v11 = vpop.f32.mrf.mxu1 }
 0x394   : > { %v1280_v17 = vsel %vm880_vm4, %v2751_v11, -inf }
 0x395   : > { %v2116_v12 = vpop.f32.mrf.mxu1 }
 0x396   : > { %910 = vrot.lane.b32.xlu1 %v2714_v44, %s2444_s5  ;;  %s3047_s5 = sld [smem:[#allocation8_spill]] }
 0x397   : > { %v2754_v13 = vpop.f32.mrf.mxu1 }
 0x398   : > { %v1283_v14 = vsel %vm880_vm4, %v2754_v13, -inf }
 0x399   : > { %v2117_v15 = vpop.f32.mrf.mxu1  ;;  %1284 = vmax.xlane.f32.xlu0 %v1283_v14 }
 0x39c   : > { %p2017_p1 = scmp.ne.s32.totalorder %s3047_s5, 1 }
 0x3af   : > { %1043 = vrot.lane.b32.xlu0 %v2714_v44, %s2445_s13  ;;  %s3048_s13 = sld [smem:[#allocation23_spill]] (!%p2017_p1) }
 0x3ba   : > { %1148 = vmax.xlane.f32.xlu1 %v1147_v16 }
 0x3be   : > { %1281 = vmax.xlane.f32.xlu1 %v1280_v17 }
 0x3cf   : > { %1176 = vrot.lane.b32.xlu1 %v2714_v44, %s2446_s18 }
 0x3d3   : > { %1309 = vrot.lane.b32.xlu1 %v2714_v44, %s2447_s19 }
 0x40e   : > { %v2765_v19 = vpop.xlane.xlu0 %1015  ;;  %v2767_v20 = vpop.xlane.xlu1 %882 }
 0x40f   : > { %v1026_v21 = vsub.f32 %v1007_v57, %v2765_v19  ;;  %v893_v22 = vsub.f32 %v873_v56, %v2767_v20 }
 0x411   : > { %v1028_v23 = vmul.f32 1.442695, %v1026_v21  ;;  %v895_v26 = vmul.f32 1.442695, %v893_v22 }
 0x412   : > { %v911_v24 = vpop.permute.xlu1 %910  ;;  %v2771_v25 = vpop.xlane.xlu0 %885 }
 0x413   : > { %v894_v27 = vsub.f32 %v876_v62, %v2771_v25  ;;  %2083 = vmatpush3.bf16.msra.mxu0 %v911_v24  ;;  %2281 = vpow2.f32 %v1028_v23 }
 0x414   : > { %2094 = vmatprep.subr.bf16.mxu0 %v2435_v18  ;;  %2283 = vpow2.f32 %v895_v26 }
 0x415   : > { %v897_v28 = vmul.f32 1.442695, %v894_v27 }
 0x416   : > { %v2775_v29 = vpop.xlane.xlu0 %1018 }
 0x417   : > { %v1027_v30 = vsub.f32 %v1010_v63, %v2775_v29  ;;  %2285 = vpow2.f32 %v897_v28  ;;  %v1021_v6 = vsub.f32 -inf, %v2775_v29 }
 0x419   : > { %v1030_v31 = vmul.f32 1.442695, %v1027_v30  ;;  %v1024_v9 = vmul.f32 1.442695, %v1021_v6 }
 0x41a   : > { %v2778_v32 = vpop.xlane.xlu0 %1151 }
 0x41b   : > { %2287 = vpow2.f32 %v1030_v31  ;;  %v1160_v43 = vsub.f32 %v1143_v8, %v2778_v32  ;;  %v887_v8 = vsub.f32 -inf, %v2767_v20 }
 0x41d   : > { %v1163_v45 = vmul.f32 1.442695, %v1160_v43  ;;  %v889_v10 = vmul.f32 1.442695, %v887_v8 }
 0x41f   : > { %2289 = vpow2.f32 %v1163_v45 }
 0x420   : > { %v2282_v33 = vpop.eup %2281 }
 0x421   : > { %v1034_v34 = vsel %vm880_vm4, %v2282_v33, 0.0  ;;  %v2284_v36 = vpop.eup %2283 }
 0x422   : > { %v2781_v35 = vpop.xlane.xlu0 %1284  ;;  %1035 = vadd.xlane.f32.xlu1 %v1034_v34  ;;  %v901_v63 = vsel %vm880_vm4, %v2284_v36, 0.0 }
 0x423   : > { %v1293_v48 = vsub.f32 %v2754_v13, %v2781_v35 }
 0x424   : > { %v2286_v37 = vpop.eup %2285 }
 0x425   : > { %v909_v39 = vpack.c.bf16 %v2286_v37, %v2284_v36  ;;  %v1296_v52 = vmul.f32 1.442695, %v1293_v48  ;;  %v904_v2 = vsel %vm880_vm4, %v2286_v37, 0.0 }
 0x426   : > { %v1044_v38 = vpop.permute.xlu0 %1043 }
 0x427   : > { %2085 = vmatmul.mubr.msk.bf16.vlgmr.msra.gmra.mxu0 %vm880_vm4, %v909_v39 }
 0x428   : > { %v2288_v40 = vpop.eup %2287  ;;  %2095 = vmatpush3.bf16.msra.mxu0 %v1044_v38  ;;  %2096 = vmatprep.mubr.msk.bf16.mxu0 %vm2436_vm2, %v2435_v18 }
 0x429   : > { %v1037_v41 = vsel %vm880_vm4, %v2288_v40, 0.0  ;;  %2106 = vmatprep.subr.bf16.mxu0 %v2435_v18  ;;  %v1042_v42 = vpack.c.bf16 %v2288_v40, %v2282_v33 }
 0x42a   : > { %1038 = vadd.xlane.f32.xlu0 %v1037_v41 }
 0x42c   : > { %v2290_v54 = vpop.eup %2289 }
 0x42d   : > { %v1170_v61 = vsel %vm880_vm4, %v2290_v54, 0.0 }
 0x42f   : > { %2097 = vmatmul.mubr.msk.bf16.vlgmr.msra.gmra.mxu0 %vm880_vm4, %v1042_v42 }
 0x430   : > { %2108 = vmatprep.mubr.msk.bf16.mxu0 %vm2436_vm2, %v2435_v18 }
 0x443   : > { %v2792_v44 = vpop.xlane.xlu1 %1148 }
 0x444   : > { %v1159_v46 = vsub.f32 %v2747_v5, %v2792_v44  ;;  %v1020_v5 = vsub.f32 -inf, %v2765_v19  ;;  %v1153_v45 = vsub.f32 -inf, %v2792_v44 }
 0x446   : > { %v1161_v47 = vmul.f32 1.442695, %v1159_v46  ;;  %v1022_v7 = vmul.f32 1.442695, %v1020_v5 }
 0x447   : > { %v2798_v49 = vpop.xlane.xlu1 %1281 }
 0x448   : > { %v1292_v50 = vsub.f32 %v2751_v11, %v2798_v49  ;;  %2291 = vpow2.f32 %v1161_v47  ;;  %v888_v11 = vsub.f32 -inf, %v2771_v25  ;;  %v1154_v47 = vsub.f32 -inf, %v2778_v32 }
 0x449   : > { %v1287_v32 = vsub.f32 -inf, %v2781_v35 }
 0x44a   : > { %v1294_v51 = vmul.f32 1.442695, %v1292_v50  ;;  %v891_v12 = vmul.f32 1.442695, %v888_v11 }
 0x44b   : > { %v1177_v53 = vpop.permute.xlu1 %1176 }
 0x44c   : > { %2107 = vmatpush3.bf16.msra.mxu0 %v1177_v53  ;;  %2293 = vpow2.f32 %v1294_v51 }
 0x44d   : > { %2118 = vmatprep.subr.bf16.mxu0 %v2435_v18  ;;  %2295 = vpow2.f32 %v1296_v52 }
 0x44e   : > { %2297 = vpow2.f32 %v1022_v7 }
 0x44f   : > { %v1310_v58 = vpop.permute.xlu1 %1309  ;;  %2299 = vpow2.f32 %v1024_v9 }
 0x450   : > { %2301 = vpow2.f32 %v889_v10 }
 0x451   : > { %2303 = vpow2.f32 %v891_v12 }
 0x455   : > { %v2292_v55 = vpop.eup %2291 }
 0x456   : > { %v1167_v56 = vsel %vm880_vm4, %v2292_v55, 0.0  ;;  %v1175_v57 = vpack.c.bf16 %v2290_v54, %v2292_v55  ;;  %v1155_v54 = vmul.f32 1.442695, %v1153_v45 }
 0x457   : > { %1168 = vadd.xlane.f32.xlu0 %v1167_v56 }
 0x458   : > { %2109 = vmatmul.mubr.msk.bf16.vlgmr.msra.gmra.mxu0 %vm880_vm4, %v1175_v57  ;;  %v1157_v57 = vmul.f32 1.442695, %v1154_v47 }
 0x459   : > { %v2294_v59 = vpop.eup %2293  ;;  %2119 = vmatpush3.bf16.msra.mxu0 %v1310_v58  ;;  %2120 = vmatprep.mubr.msk.bf16.mxu0 %vm2436_vm2, %v2435_v18 }
 0x45a   : > { %v1300_v60 = vsel %vm880_vm4, %v2294_v59, 0.0  ;;  %2132 = vmatprep.subr.bf16.mxu0 %v2435_v18  ;;  %v2296_v62 = vpop.eup %2295 }
 0x45b   : > { %1301 = vadd.xlane.f32.xlu1 %v1300_v60  ;;  %1171 = vadd.xlane.f32.xlu0 %v1170_v61  ;;  %v1303_v0 = vsel %vm880_vm4, %v2296_v62, 0.0  ;;  %v1308_v1 = vpack.c.bf16 %v2296_v62, %v2294_v59  ;;  %v2298_v14 = vpop.eup %2297  ;;  %v1286_v61 = vsub.f32 -inf, %v2798_v49 }
 0x45c   : > { %v2300_v15 = vpop.eup %2299  ;;  %v1032_v19 = vmul.f32 0.0, %v2298_v14  ;;  %v2265_v14 = vld [vmem:[%s2634_s26 + $0x8] sm:$0xff]  }
 0x45d   : > { %v1033_v21 = vmul.f32 0.0, %v2300_v15  ;;  %v2302_v22 = vpop.eup %2301  ;;  %2125 = vmatpush3.bf16.msra.mxu1 %v2265_v14 }
 0x45e   : > { %v899_v27 = vmul.f32 0.0, %v2302_v22  ;;  %v2304_v28 = vpop.eup %2303  ;;  %2126 = vmatprep.subr.bf16.mxu1 %v2435_v18 }
 0x45f   : > { %902 = vadd.xlane.f32.xlu1 %v901_v63  ;;  %1304 = vadd.xlane.f32.xlu0 %v1303_v0  ;;  %v900_v36 = vmul.f32 0.0, %v2304_v28  ;;  %v1288_v63 = vmul.f32 1.442695, %v1286_v61  ;;  %v1290_v0 = vmul.f32 1.442695, %v1287_v32 }
 0x460   : > { %2121 = vmatmul.mubr.msk.bf16.vlgmr.msra.gmra.mxu0 %vm880_vm4, %v1308_v1 }
 0x461   : > { %2136 = vmatprep.mubr.msk.bf16.mxu0 %vm2436_vm2, %v2435_v18 }
 0x463   : > { %905 = vadd.xlane.f32.xlu0 %v904_v2 }
 0x4ab   : > { %v1036_v16 = vpop.xlane.xlu1 %1035 }
 0x4ac   : > { %v1040_v23 = vadd.f32 %v1036_v16, %v1032_v19 }
 0x4ae   : > { %2305 = vrcp.f32 %v1040_v23 }
 0x4b3   : > { %v1039_v13 = vpop.xlane.xlu0 %1038 }
 0x4b4   : > { %v1041_v24 = vadd.f32 %v1039_v13, %v1033_v21 }
 0x4b6   : > { %2307 = vrcp.f32 %v1041_v24 }
 0x4bb   : > { %v2306_v50 = vpop.eup %2305 }
 0x4c3   : > { %v2308_v52 = vpop.eup %2307 }
 0x4e0   : > { %v1169_v17 = vpop.xlane.xlu0 %1168 }
 0x4e4   : > { %v1302_v20 = vpop.xlane.xlu1 %1301  ;;  %v1172_v26 = vpop.xlane.xlu0 %1171 }
 0x4e7   : > { %v950_v25 = vpop.f32.mrf.mxu0 }
 0x4e8   : > { %v957_v29 = vadd.f32 %v950_v25, %v899_v27  ;;  %v903_v30 = vpop.xlane.xlu1 %902  ;;  %v1305_v31 = vpop.xlane.xlu0 %1304 }
 0x4e9   : > { %v907_v33 = vadd.f32 %v903_v30, %v899_v27  ;;  %v2086_v34 = vpop.f32.mrf.mxu0 }
 0x4eb   : > { %2309 = vrcp.f32 %v907_v33  ;;  %v953_v37 = vpop.f32.mrf.mxu0 }
 0x4ec   : > { %v958_v38 = vadd.f32 %v953_v37, %v900_v36  ;;  %v906_v39 = vpop.xlane.xlu0 %905 }
 0x4ed   : > { %v908_v40 = vadd.f32 %v906_v39, %v900_v36  ;;  %v2087_v41 = vpop.f32.mrf.mxu0 }
 0x4ef   : > { %2311 = vrcp.f32 %v908_v40  ;;  %v1083_v42 = vpop.f32.mrf.mxu0 }
 0x4f0   : > { %v1090_v46 = vadd.f32 %v1083_v42, %v1032_v19  ;;  %2313 = vpow2.f32 %v1155_v54 }
 0x4f1   : > { %v2098_v43 = vpop.f32.mrf.mxu0  ;;  %2315 = vpow2.f32 %v1157_v57 }
 0x4f2   : > { %v1094_v55 = vmul.f32 %v2306_v50, %v1090_v46  ;;  %2317 = vpow2.f32 %v1288_v63 }
 0x4f3   : > { %v1086_v48 = vpop.f32.mrf.mxu0  ;;  %2319 = vpow2.f32 %v1290_v0 }
 0x4f4   : > { %v1091_v51 = vadd.f32 %v1086_v48, %v1033_v21 }
 0x4f5   : > { %v2099_v53 = vpop.f32.mrf.mxu0 }
 0x4f6   : > { %v1095_v56 = vmul.f32 %v2308_v52, %v1091_v51 }
 0x4f8   : > { %v2310_v58 = vpop.eup %2309  ;;  %v2248_v59 = vpack.i.bf16 %v1095_v56, %v1094_v55 }
 0x4f9   : > { %v2822_v60 = vmul.f32 %v2310_v58, %v957_v29  ;;  %v1998_v58 = vld [vmem:[%s3044_s17] ss:$0 sm:$0xff] }
 0x4fa   : > { %2249 = vrot.lane.b32.xlu1 %v2248_v59, %s2448_s20 }
 0x4fc   : > { %v2312_v44 = vpop.eup %2311 }
 0x4fd   : > { %v962_v62 = vmul.f32 %v2312_v44, %v958_v38  ;;  %v2314_v1 = vpop.eup %2313 }
 0x4fe   : > { %v2316_v2 = vpop.eup %2315  ;;  %v1165_v5 = vmul.f32 0.0, %v2314_v1 }
 0x4ff   : > { %v1166_v6 = vmul.f32 0.0, %v2316_v2  ;;  %v2318_v49 = vpop.eup %2317 }
 0x500   : > { %v1173_v7 = vadd.f32 %v1169_v17, %v1165_v5  ;;  %v2320_v9 = vpop.eup %2319  ;;  %v1298_v10 = vmul.f32 0.0, %v2318_v49 }
 0x501   : > { %v1174_v8 = vadd.f32 %v1172_v26, %v1166_v6  ;;  %v1299_v11 = vmul.f32 0.0, %v2320_v9 }
 0x502   : > { %2321 = vrcp.f32 %v1173_v7  ;;  %v1306_v35 = vadd.f32 %v1302_v20, %v1298_v10  ;;  %v2266_v20 = vld [vmem:[%s2634_s26] sm:$0xff]  }
 0x503   : > { %2323 = vrcp.f32 %v1174_v8  ;;  %v1307_v12 = vadd.f32 %v1305_v31, %v1299_v11  ;;  %2127 = vmatpush3.bf16.msra.mxu1 %v2266_v20  ;;  %v2003_v20 = vld [vmem:[%s682_s0] ss:$0 sm:$0xff] }
 0x504   : > { %2325 = vrcp.f32 %v1306_v35  ;;  %2140 = vmatprep.subr.bf16.mxu1 %v2435_v18  ;;  %v2267_v35 = vld [vmem:[%s2651_s23 + $0x8] sm:$0xff]  }
 0x505   : > { %2327 = vrcp.f32 %v1307_v12  ;;  %2133 = vmatpush3.bf16.msra.mxu0 %v2267_v35  ;;  %v2268_v12 = vld [vmem:[%s2651_s23] sm:$0xff]   ;;  %s3046_s23 = scalar_lea.vmem %s3045_s30, %s2608_s16 }
 0x506   : > { %2134 = vmatprep.subr.bf16.mxu0 %v2435_v18 }
 0x509   : > { %2135 = vmatpush3.bf16.msra.mxu0 %v2268_v12 }
 0x50f   : > { %v2322_v19 = vpop.eup %2321 }
 0x510   : > { %v2324_v22 = vpop.eup %2323 }
 0x511   : > { %v2326_v31 = vpop.eup %2325 }
 0x512   : > { %v2328_v34 = vpop.eup %2327 }
 0x518   : > { %v1216_v13 = vpop.f32.mrf.mxu0 }
 0x519   : > { %v1223_v16 = vadd.f32 %v1216_v13, %v1165_v5 }
 0x51a   : > { %v2110_v15 = vpop.f32.mrf.mxu0 }
 0x51b   : > { %v1227_v24 = vmul.f32 %v2322_v19, %v1223_v16 }
 0x51c   : > { %v1219_v17 = vpop.f32.mrf.mxu0 }
 0x51d   : > { %v1224_v21 = vadd.f32 %v1219_v17, %v1166_v6 }
 0x51e   : > { %v2111_v23 = vpop.f32.mrf.mxu0 }
 0x51f   : > { %v1228_v26 = vmul.f32 %v2324_v22, %v1224_v21  ;;  %v2002_v23 = vld [vmem:[%s3046_s23] ss:$0 sm:$0xff] }
 0x520   : > { %v1349_v27 = vpop.f32.mrf.mxu0 }
 0x521   : > { %v2253_v28 = vpack.i.bf16 %v1228_v26, %v1227_v24  ;;  %v1356_v29 = vadd.f32 %v1349_v27, %v1298_v10 }
 0x522   : > { %v2122_v25 = vpop.f32.mrf.mxu0 }
 0x523   : > { %2254 = vrot.lane.b32.xlu0 %v2253_v28, %s2449_s27  ;;  %v1360_v37 = vmul.f32 %v2326_v31, %v1356_v29  ;;  %v2269_v31 = vld [vmem:[%s2665_s7 + $0x38] sm:$0xff]   ;;  %s3049_s27 = sld [smem:[#allocation24_spill]] (!%p2017_p1) }
 0x524   : > { %v1352_v30 = vpop.f32.mrf.mxu0 }
 0x525   : > { %v1357_v33 = vadd.f32 %v1352_v30, %v1299_v11 }
 0x526   : > { %v2123_v36 = vpop.f32.mrf.mxu0 }
 0x527   : > { %v1361_v38 = vmul.f32 %v2328_v34, %v1357_v33  ;;  %v2270_v33 = vld [vmem:[%s2665_s7 + $0x30] sm:$0xff]   ;;  %v2271_v34 = vld [vmem:[%s2665_s7 + $0x28] sm:$0xff]   ;;  %v2272_v36 = vld [vmem:[%s2665_s7 + $0x20] sm:$0xff]  }
 0x529   : > { %v2258_v39 = vpack.i.bf16 %v1361_v38, %v1360_v37  ;;  %v2273_v37 = vld [vmem:[%s2665_s7 + $0x18] sm:$0xff]   ;;  %v2274_v38 = vld [vmem:[%s2665_s7 + $0x10] sm:$0xff]  }
 0x52b   : > { %2259 = vrot.lane.b32.xlu1 %v2258_v39, %s2450_s21  ;;  %v2275_v39 = vld [vmem:[%s2665_s7 + $0x8] sm:$0xff]  }
 0x56c   : > { %v2250_v40 = vpop.permute.xlu1 %2249 }
 0x56d   : > { %v2252_v42 = vunpack.i.h.bf16 %v2250_v40  ;;  %v2251_v43 = vunpack.i.l.bf16 %v2250_v40  ;;  %v2276_v40 = vld [vmem:[%s2665_s7] sm:$0xff]  }
 0x56f   : > { %v1387_v48 = vsel %vm832_vm3, %v962_v62, %v2252_v42  ;;  %v1386_v50 = vsel %vm832_vm3, %v2822_v60, %v2251_v43 }
 0x595   : > { %v2255_v41 = vpop.permute.xlu0 %2254 }
 0x596   : > { %v2257_v45 = vunpack.i.h.bf16 %v2255_v41  ;;  %v2256_v46 = vunpack.i.l.bf16 %v2255_v41  ;;  %v2004_v41 = vld [vmem:[%s690_s11] ss:$0 sm:$0xff] }
 0x598   : > { %v1389_v53 = vsel %vm880_vm4, %v1387_v48, %v2257_v45  ;;  %v1388_v54 = vsel %vm880_vm4, %v1386_v50, %v2256_v46 }
 0x59d   : > { %v2260_v47 = vpop.permute.xlu1 %2259 }
 0x59e   : > { %v2262_v51 = vunpack.i.h.bf16 %v2260_v47  ;;  %v2261_v52 = vunpack.i.l.bf16 %v2260_v47 }
 0x5a0   : > { %v1392_v55 = vsel %vm1390_vm5, %v1389_v53, %v2262_v51  ;;  %v1391_v56 = vsel %vm1390_vm5, %v1388_v54, %v2261_v52 }
 0x5a1   : > { %v1393_v57 = vpack.c.bf16 %v1392_v55, %v1391_v56 }
 0x5a3   : > { %2129 = vmatmul.mubr.msk.bf16.vlgmr.msra.gmra.mxu1 %vm716_vm1, %v1393_v57 }
 0x5a4   : > { %2156 = vmatprep.mubr.msk.bf16.mxu1 %vm2436_vm2, %v2435_v18  ;;  %2141 = vmatpush3.bf16.msra.mxu1 %v2269_v31 }
 0x5a5   : > { %2142 = vmatprep.subr.bf16.mxu1 %v2435_v18 }
 0x5a8   : > { %2143 = vmatpush3.bf16.msra.mxu1 %v2270_v33 }
 0x5a9   : > { %2144 = vmatprep.subr.bf16.mxu1 %v2435_v18 }
 0x5ac   : > { %2145 = vmatpush3.bf16.msra.mxu1 %v2271_v34 }
 0x5ad   : > { %2146 = vmatprep.subr.bf16.mxu1 %v2435_v18 }
 0x5b0   : > { %2147 = vmatpush3.bf16.msra.mxu1 %v2272_v36 }
 0x5b1   : > { %2148 = vmatprep.subr.bf16.mxu1 %v2435_v18 }
 0x5b4   : > { %2149 = vmatpush3.bf16.msra.mxu1 %v2273_v37 }
 0x5b5   : > { %2150 = vmatprep.subr.bf16.mxu1 %v2435_v18 }
 0x5b8   : > { %2151 = vmatpush3.bf16.msra.mxu1 %v2274_v38 }
 0x5b9   : > { %2152 = vmatprep.subr.bf16.mxu1 %v2435_v18 }
 0x5bc   : > { %2153 = vmatpush3.bf16.msra.mxu1 %v2275_v39 }
 0x5bd   : > { %2154 = vmatprep.subr.bf16.mxu1 %v2435_v18 }
 0x5c0   : > { %2155 = vmatpush3.bf16.msra.mxu1 %v2276_v40 }
 0x663   : > { %v1454_v59 = vpop.f32.mrf.mxu1 }
 0x664   : > { %v1455_v60 = vadd.f32 %v1998_v58, %v1454_v59 }
 0x665   : > { %v2130_v61 = vpop.f32.mrf.mxu1 }
 0x666   : > { %v2845_v32 = vadd.f32 %v1455_v60, %v2673_v3 }
 0x667   : > { %v1457_v44 = vpop.f32.mrf.mxu1 }
 0x668   : > { %v1458_v62 = vadd.f32 %v1998_v58, %v1457_v44  ;;  %v1465_v63 = vsel %vm716_vm1, %v2845_v32, 0.0 }
 0x669   : > { %1466 = vadd.xlane.f32.xlu1 %v1465_v63  ;;  %v2131_v0 = vpop.f32.mrf.mxu1 }
 0x66a   : > { %v2850_v1 = vadd.f32 %v1458_v62, %v2676_v4 }
 0x66c   : > { %v1468_v2 = vsel %vm716_vm1, %v2850_v1, 0.0 }
 0x66d   : > { %1469 = vadd.xlane.f32.xlu0 %v1468_v2 }
 0x6f2   : > { %v1467_v5 = vpop.xlane.xlu1 %1466 }
 0x6f3   : > { %v1471_v6 = vmul.f32 0.03125, %v1467_v5 }
 0x6f5   : > { %v1473_v3 = vsub.f32 %v2845_v32, %v1471_v6  ;;  %v2008_v6 = vld [vmem:[%s698_s15] ss:$0 sm:$0xff] }
 0x6f6   : > { %v1470_v7 = vpop.xlane.xlu0 %1469 }
 0x6f7   : > { %v1472_v8 = vmul.f32 0.03125, %v1470_v7  ;;  %v1475_v49 = vmul.f32 %v1473_v3, %v1473_v3 }
 0x6f9   : > { %v1474_v9 = vsub.f32 %v2850_v1, %v1472_v8  ;;  %v1477_v10 = vsel %vm716_vm1, %v1475_v49, 0.0 }
 0x6fa   : > { %1478 = vadd.xlane.f32.xlu0 %v1477_v10 }
 0x6fb   : > { %v1476_v11 = vmul.f32 %v1474_v9, %v1474_v9 }
 0x6fd   : > { %v1480_v4 = vsel %vm716_vm1, %v1476_v11, 0.0 }
 0x6fe   : > { %1481 = vadd.xlane.f32.xlu1 %v1480_v4 }
 0x783   : > { %v1479_v13 = vpop.xlane.xlu0 %1478 }
 0x784   : > { %v1483_v14 = vmul.f32 0.03125, %v1479_v13 }
 0x786   : > { %v1485_v15 = vadd.f32 1e-05, %v1483_v14 }
 0x787   : > { %v1482_v16 = vpop.xlane.xlu1 %1481 }
 0x788   : > { %2329 = vrsqrt.f32 %v1485_v15  ;;  %v1484_v17 = vmul.f32 0.03125, %v1482_v16 }
 0x78a   : > { %v1486_v19 = vadd.f32 1e-05, %v1484_v17 }
 0x78c   : > { %2331 = vrsqrt.f32 %v1486_v19 }
 0x795   : > { %v2330_v21 = vpop.eup %2329 }
 0x796   : > { %v1489_v22 = vmul.f32 %v2330_v21, %v1473_v3 }
 0x798   : > { %v1497_v27 = vmul.f32 %v2002_v23, %v1489_v22 }
 0x799   : > { %v2332_v24 = vpop.eup %2331 }
 0x79a   : > { %v1490_v26 = vmul.f32 %v2332_v24, %v1474_v9  ;;  %v1505_v25 = vadd.f32 %v2003_v20, %v1497_v27 }
 0x79c   : > { %v1498_v28 = vmul.f32 %v2002_v23, %v1490_v26 }
 0x79e   : > { %v1506_v29 = vadd.f32 %v2003_v20, %v1498_v28 }
 0x7a0   : > { %v1507_v30 = vpack.c.bf16 %v1506_v29, %v1505_v25 }
 0x7a2   : > { %2137 = vmatmul.mubr.msk.bf16.vlgmr.msra.gmra.mxu0 %vm716_vm1, %v1507_v30 }
 0x862   : > { %v1568_v42 = vpop.f32.mrf.mxu0 }
 0x863   : > { %v1569_v43 = vadd.f32 %v2004_v41, %v1568_v42 }
 0x864   : > { %v2138_v45 = vpop.f32.mrf.mxu0 }
 0x865   : > { %v1577_v46 = vmul.f32 0.044715, %v1569_v43  ;;  %v1575_v44 = vmul.f32 0.5, %v1569_v43 }
 0x866   : > { %v1571_v47 = vpop.f32.mrf.mxu0 }
 0x867   : > { %v1579_v48 = vmul.f32 %v1577_v46, %v1569_v43  ;;  %v1572_v50 = vadd.f32 %v2004_v41, %v1571_v47 }
 0x868   : > { %v2139_v51 = vpop.f32.mrf.mxu0 }
 0x869   : > { %v1581_v52 = vmul.f32 %v1579_v48, %v1569_v43  ;;  %v1578_v53 = vmul.f32 0.044715, %v1572_v50  ;;  %v1576_v62 = vmul.f32 0.5, %v1572_v50 }
 0x86b   : > { %v1583_v54 = vadd.f32 %v1581_v52, %v1569_v43  ;;  %v1580_v55 = vmul.f32 %v1578_v53, %v1572_v50 }
 0x86d   : > { %v1585_v56 = vmul.f32 0.7978846, %v1583_v54  ;;  %v1582_v18 = vmul.f32 %v1580_v55, %v1572_v50 }
 0x86f   : > { %2333 = vtanh.f32 %v1585_v56  ;;  %v1584_v57 = vadd.f32 %v1582_v18, %v1572_v50 }
 0x871   : > { %v1586_v58 = vmul.f32 0.7978846, %v1584_v57 }
 0x873   : > { %2335 = vtanh.f32 %v1586_v58 }
 0x87c   : > { %v2334_v59 = vpop.eup %2333 }
 0x87d   : > { %v1589_v60 = vadd.f32 1.0, %v2334_v59 }
 0x87f   : > { %v1591_v0 = vmul.f32 %v1589_v60, %v1575_v44 }
 0x880   : > { %v2336_v61 = vpop.eup %2335 }
 0x881   : > { %v1590_v63 = vadd.f32 1.0, %v2336_v61 }
 0x883   : > { %v1592_v2 = vmul.f32 %v1590_v63, %v1576_v62 }
 0x885   : > { %v1593_v5 = vpack.c.bf16 %v1592_v2, %v1591_v0 }
 0x887   : > { %2157 = vmatmul.mubr.bf16.vlgmr.msra.gmra.mxu1 %v1593_v5 }
 0x947   : > { %v1699_v3 = vpop.f32.mrf.mxu1 }
 0x948   : > { %v1700_v7 = vadd.f32 %v2008_v6, %v1699_v3 }
 0x949   : > { %v2158_v8 = vpop.f32.mrf.mxu1 }
 0x94a   : > { %v1706_v49 = vadd.f32 %v1700_v7, %v2845_v32 }
 0x94b   : > { %v1702_v9 = vpop.f32.mrf.mxu1 }
 0x94c   : > { %1708 = vst.msk [vmem:[%s2667_s14] sm:$0xff] %vm716_vm1, %v1706_v49  ;;  %v1703_v10 = vadd.f32 %v2008_v6, %v1702_v9  ;;  %1713 = sbr.rel (%p2017_p1) target bundleno = 2698 (0xa8a), region = 88 }
 0x94d   : > { %v2159_v11 = vpop.f32.mrf.mxu1 }
 0x94e   : > { %v1707_v4 = vadd.f32 %v1703_v10, %v2850_v1 }
 0x950   : > { %1709 = vst.msk [vmem:[%s2667_s14 + $0x8] sm:$0xff] %vm716_vm1, %v1707_v4 }
 0x951   : > { %v1716_v35 = vsel %vm716_vm1, %v1706_v49, 0.0  ;;  %v1719_v12 = vsel %vm716_vm1, %v1707_v4, 0.0  ;;  %v2018_v29 = vld [vmem:[%s3048_s13] ss:$0 sm:$0xff] }
 0x952   : > { %1717 = vadd.xlane.f32.xlu0 %v1716_v35  ;;  %v2019_v31 = vld [vmem:[%s3049_s27] ss:$0 sm:$0xff] }
 0x956   : > { %1720 = vadd.xlane.f32.xlu0 %v1719_v12 }
 0x9db   : > { %v1718_v13 = vpop.xlane.xlu0 %1717 }
 0x9dc   : > { %v1722_v32 = vmul.f32 0.03125, %v1718_v13 }
 0x9de   : > { %v1724_v14 = vsub.f32 %v1706_v49, %v1722_v32 }
 0x9df   : > { %v1721_v15 = vpop.xlane.xlu0 %1720 }
 0x9e0   : > { %v1723_v16 = vmul.f32 0.03125, %v1721_v15  ;;  %v1726_v17 = vmul.f32 %v1724_v14, %v1724_v14 }
 0x9e2   : > { %v1725_v19 = vsub.f32 %v1707_v4, %v1723_v16  ;;  %v1728_v1 = vsel %vm716_vm1, %v1726_v17, 0.0 }
 0x9e3   : > { %1729 = vadd.xlane.f32.xlu1 %v1728_v1 }
 0x9e4   : > { %v1727_v21 = vmul.f32 %v1725_v19, %v1725_v19 }
 0x9e6   : > { %v1731_v22 = vsel %vm716_vm1, %v1727_v21, 0.0 }
 0x9e7   : > { %1732 = vadd.xlane.f32.xlu1 %v1731_v22 }
 0xa6c   : > { %v1730_v23 = vpop.xlane.xlu1 %1729 }
 0xa6d   : > { %v1734_v24 = vmul.f32 0.03125, %v1730_v23 }
 0xa6f   : > { %v1736_v26 = vadd.f32 1e-05, %v1734_v24 }
 0xa70   : > { %v1733_v27 = vpop.xlane.xlu1 %1732 }
 0xa71   : > { %2337 = vrsqrt.f32 %v1736_v26  ;;  %v1735_v20 = vmul.f32 0.03125, %v1733_v27 }
 0xa73   : > { %v1737_v28 = vadd.f32 1e-05, %v1735_v20 }
 0xa75   : > { %2339 = vrsqrt.f32 %v1737_v28 }
 0xa7e   : > { %v2338_v25 = vpop.eup %2337 }
 0xa7f   : > { %v1740_v30 = vmul.f32 %v2338_v25, %v1724_v14 }
 0xa81   : > { %v1748_v33 = vmul.f32 %v2018_v29, %v1740_v30 }
 0xa82   : > { %v2340_v34 = vpop.eup %2339 }
 0xa83   : > { %v1756_v36 = vadd.f32 %v2019_v31, %v1748_v33  ;;  %v1741_v37 = vmul.f32 %v2340_v34, %v1725_v19 }
 0xa85   : > { %1758 = vst.msk [vmem:[%s2667_s14] sm:$0xff] %vm716_vm1, %v1756_v36  ;;  %v1749_v38 = vmul.f32 %v2018_v29, %v1741_v37 }
 0xa87   : > { %v1757_v39 = vadd.f32 %v2019_v31, %v1749_v38 }
 0xa89   : > { %1759 = vst.msk [vmem:[%s2667_s14 + $0x8] sm:$0xff] %vm716_vm1, %v1757_v39 }
 0xa8a PF: > { %s3050_s21 = sld [smem:[#allocation9_spill]]  ;;  %s1774_s25 = sshll.u32 %s2667_s14, 4  ;;  %s2925_s25 = int_to_ptr.vmem [resolvable:$true] %s1774_s25 }
 0xa8b   : > { %s3051_s26 = sld [smem:[#allocation6_spill]]  ;;  %s2341_s3 = scalar_lea.vmem %s2925_s25, 256 }
 0xa8c   : > { %s3053_s30 = sld [smem:[#allocation25_spill]]  ;;  %p2342_p2 = scmp.ne.s32.totalorder %s2925_s25, %s2341_s3 }
 0xa8d   : > { %s2451_s7 = smov [#allocation2]  }
 0xa8e   : > { %p2343_p4 = pnand %p2342_p2, %p2582_p3  ;;  %s2345_s11 = sshll.u32 %s2451_s7, 4  ;;  %s2346_s11 = int_to_ptr.vmem [resolvable:$false] %s2345_s11 }
 0xa8f   : > { %s2347_s5 = scalar_lea.vmem %s2346_s11, 512  ;;  %p2348_p6 = scmp.lt.s32.totalorder %s2925_s25, %s2346_s11 }
 0xa90   : > { %s2029_s17 = sshll.u32 %s3050_s21, 8  ;;  %p2344_p5 = pneg %p2343_p4 }
 0xa91   : > { %s3054_s22 = sand.u32 1, %s3051_s26   ;;  %p2349_p7 = scmp.lt.s32.totalorder %s2347_s5, %s2341_s3 }
 0xa92   : > { %s2922_s23 = scalar_lea.hbm %s3053_s30, %s2029_s17  ;;  %s2929_s0 = scalar_lea.sflag [#allocation3], %s3054_s22 }
 0xa93   : > { %p2350_p8 = por %p2349_p7, %p2348_p6 }
 0xa95   : > { %p2351_p10 = pnand %p2350_p8, %p2344_p5 }
 0xa97   : > { %2354 = shalt.err (!%p2351_p10)
}
 0xa98   : > { %s2355_s14 = scalar_lea.hbm %s2922_s23, 256  ;;  %s2359_s13 = scalar_lea.hbm %s3053_s30, 512 }
 0xa99   : > { %p2356_p11 = scmp.ne.s32.totalorder %s2922_s23, %s2355_s14  ;;  %p2360_p0 = scmp.lt.s32.totalorder %s2922_s23, %s3053_s30 }
 0xa9a   : > { %p2361_p1 = scmp.lt.s32.totalorder %s2359_s13, %s2355_s14 }
 0xa9b   : > { %p2357_p12 = pnand %p2356_p11, %p2582_p3 }
 0xa9c   : > { %p2362_p2 = por %p2361_p1, %p2360_p0 }
 0xa9d   : > { %p2358_p13 = pneg %p2357_p12 }
 0xa9f   : > { %p2363_p4 = pnand %p2362_p2, %p2358_p13 }
 0xaa1   : > { %2366 = shalt.err (!%p2363_p4)
}
 0xaa2   : > { %s2452_s27 = smov 128  }
 0xaa3   : > { %2160 = dma.vmem_to_hbm [thread:$0]  (%p2582_p3), %s2925_s25, 256, %s2922_s23, %s2929_s0, %s2452_s27, %s2452_s27, %s2448_s20  }
 0xaa4 PF: > { %s3055_s21 = sld [smem:[#allocation12_spill]] }
 0xaa5   : > { %s3056_s26 = sld [smem:[#allocation5_spill]] }
 0xaaa   : > { %p2166_p5 = scmp.ge.s32.totalorder %s3055_s21, 2 }
 0xaab   : > { %s1789_s24 = sand.u32 1, %s3056_s26  }
 0xaac   : > { %p2163_p6 = pnand %p2166_p5, %p2592_p9  ;;  %s1790_s28 = scalar_lea.sflag [#allocation3], %s1789_s24 }
 0xaae   : > { %p2164_p7 = pneg %p2163_p6 }
 0xab0   : > { %2400 = dma.done.wait (%p2164_p7), %s1790_s28, 256  }
 0xab1   : > { %2402 = vsyncadd (%p2164_p7), %s1790_s28, 4294967040  ;;  %s28_s25 = sadd.s32 1, %s3055_s21   ;;  %s3058_s18 = sld [smem:[#allocation6_spill]] }
 0xab2   : > { %p25_p8 = scmp.ge.s32.totalorder %s28_s25, 6   ;;  %s3059_s19 = sld [smem:[#allocation7_spill]] }
 0xab3   : > { %s3060_s20 = sld [smem:[#allocation17_spill]] }
 0xab4   : > { %s3061_s21 = sld [smem:[#allocation10_spill]]  ;;  %27 = sbr.rel (!%p25_p8) target bundleno = 14 (0xe), region = 159 }
 0xab5   : > { %s3062_s22 = sld [smem:[#allocation11_spill]] }
 0xab6   : > { %s3063_s23 = sld [smem:[#allocation13_spill]] }
 0xab7   : > { %s3064_s24 = sld [smem:[#allocation15_spill]] }
 0xab9   :  { %1795 = vsyncpa [#allocation3], 1 }
 0xaba   :  { %1797 = vsyncpa [#allocation3 + $0x1], 1 }

</bundles_post_ra>
